<compile_context>
chip_gen: v5e
topology: v5e:2x2
jax: 0.10.0
libtpu: 0.0.40
codegen_flags: <defaults>
</compile_context>

<pallas_src>
import jax
import jax.numpy as jnp
from jax import lax
from jax.experimental import pallas as pl
from jax.experimental.pallas import tpu as pltpu

# ---- small synthetic config (hidden_size == embed_dim in the module) ----
BATCH = 2
SEQ = 16
EMBED_DIM = 128
INTERMEDIATE = 256
NUM_HEADS = 4
HEAD_DIM = EMBED_DIM // NUM_HEADS
LN_EPS = 1e-6
SCALE = HEAD_DIM ** (-0.5)

_SQRT_2_OVER_PI = 0.7978845608028654


def _layer_norm(x, gamma, beta):
    # x: (M, D), gamma/beta: (1, D); matches torch.nn.LayerNorm (biased var)
    mu = jnp.mean(x, axis=-1, keepdims=True)
    var = jnp.mean((x - mu) * (x - mu), axis=-1, keepdims=True)
    return (x - mu) * lax.rsqrt(var + LN_EPS) * gamma + beta


def _gelu_tanh(x):
    # torch.nn.functional.gelu(x, approximate='tanh')
    inner = _SQRT_2_OVER_PI * (x + 0.044715 * x * x * x)
    return 0.5 * x * (1.0 + jnp.tanh(inner))


def encoder_layer_kernel(
    x_ref,
    ln1_g_ref, ln1_b_ref,
    wqkv_ref, bqkv_ref,          # (D, 3D) bf16 (scale folded into q), (1, 3D) f32
    wo_ref, bo_ref,              # (D, D) bf16, (1, D) f32
    ln2_g_ref, ln2_b_ref,
    w1_ref, b1_ref, w2_ref, b2_ref,
    out_ref,
):
    B, S, D = x_ref.shape
    H, HD = NUM_HEADS, HEAD_DIM
    BS = B * S

    # ---- Flatten batch into the matmul M dimension ----
    x = x_ref[...].reshape(BS, D)                          # (32, 128) f32

    # ---- LayerNorm 1 (fp32) ----
    h1 = _layer_norm(x, ln1_g_ref[...], ln1_b_ref[...])

    # ---- Fused QKV projection: single bf16 MXU matmul, fp32 accumulate ----
    qkv = jnp.dot(h1.astype(jnp.bfloat16), wqkv_ref[...],
                  preferred_element_type=jnp.float32) + bqkv_ref[...]   # (32, 3D)

    # ---- Re-layout heads from the lane axis to a leading batch axis ----
    # (B*S, H*hd) -> (H*B, S, hd); g = h*B + b.
    def split_heads(col0):
        parts = [qkv[:, col0 + h * HD: col0 + (h + 1) * HD].reshape(B, S, HD)
                 for h in range(H)]
        return jnp.concatenate(parts, axis=0).astype(jnp.bfloat16)

    qb = split_heads(0)          # (8, 16, 32) bf16  (scale already folded in)
    kb = split_heads(D)
    vb = split_heads(2 * D)

    # ---- ONE batched score matmul over all (head, batch) pairs ----
    s = jnp.einsum('gqd,gkd->gqk', qb, kb,
                   preferred_element_type=jnp.float32)     # (8, 16, 16) f32

    # ---- Single softmax pass over every head / batch row ----
    s = s - jnp.max(s, axis=-1, keepdims=True)
    p = jnp.exp(s)
    p = p * pl.reciprocal(jnp.sum(p, axis=-1, keepdims=True), approx=True)
    p = p.astype(jnp.bfloat16)

    # ---- ONE batched PV matmul ----
    o = jnp.einsum('gqk,gkd->gqd', p, vb,
                   preferred_element_type=jnp.float32)     # (8, 16, 32) f32

    # ---- Lane-concat heads back -> single 128-deep output projection ----
    o_cols = [o[h * B:(h + 1) * B].reshape(BS, HD) for h in range(H)]
    o2d = jnp.concatenate(o_cols, axis=1).astype(jnp.bfloat16)   # (32, 128)
    attn = jnp.dot(o2d, wo_ref[...],
                   preferred_element_type=jnp.float32) + bo_ref[...]

    # ---- Residual ----
    x_mid = x + attn

    # ---- LayerNorm 2 + MLP (bf16 matmuls, fp32 gelu/bias/residual) ----
    h2 = _layer_norm(x_mid, ln2_g_ref[...], ln2_b_ref[...])
    m = jnp.dot(h2.astype(jnp.bfloat16), w1_ref[...],
                preferred_element_type=jnp.float32) + b1_ref[...]
    m = _gelu_tanh(m)
    y = jnp.dot(m.astype(jnp.bfloat16), w2_ref[...],
                preferred_element_type=jnp.float32) + b2_ref[...]

    out_ref[...] = (x_mid + y).reshape(B, S, D)


def prepare_kernel_params(p):
    """Host-side repacking: fold attention scale, fuse QKV, bf16 weights."""
    wq = p["wq"] * SCALE
    bq = p["bq"] * SCALE
    w_qkv = jnp.concatenate([wq, p["wk"], p["wv"]], axis=1).astype(jnp.bfloat16)  # (D, 3D)
    b_qkv = jnp.concatenate([bq, p["bk"], p["bv"]], axis=1)                       # (1, 3D) f32
    return dict(
        ln1_g=p["ln1_g"], ln1_b=p["ln1_b"],
        w_qkv=w_qkv, b_qkv=b_qkv,
        wo=p["wo"].astype(jnp.bfloat16), bo=p["bo"],
        ln2_g=p["ln2_g"], ln2_b=p["ln2_b"],
        w1=p["w1"].astype(jnp.bfloat16), b1=p["b1"],
        w2=p["w2"].astype(jnp.bfloat16), b2=p["b2"],
    )


def siglip_encoder_layer(x, kp):
    """x: (B, S, D) float32; kp: dict from prepare_kernel_params."""
    B, S, D = x.shape
    BS = B * S

    operands = [
        kp["ln1_g"], kp["ln1_b"],
        kp["w_qkv"], kp["b_qkv"],
        kp["wo"], kp["bo"],
        kp["ln2_g"], kp["ln2_b"],
        kp["w1"], kp["b1"], kp["w2"], kp["b2"],
    ]

    # Single grid-less invocation: every operand lives whole in VMEM (no
    # per-step pipelining / double-buffering of the invariant weights).
    vmem = pl.BlockSpec(memory_space=pltpu.MemorySpace.VMEM)

    flops = (2 * BS * D * 3 * D                               # fused QKV
             + 2 * 2 * B * NUM_HEADS * SEQ * SEQ * HEAD_DIM   # scores + PV
             + 2 * BS * D * D                                 # out projection
             + 2 * 2 * BS * D * INTERMEDIATE)                 # fc1 + fc2
    transcendentals = B * NUM_HEADS * SEQ * SEQ + BS * INTERMEDIATE + 2 * BS
    bytes_accessed = (2 * x.size * x.dtype.itemsize
                      + sum(int(a.size) * a.dtype.itemsize for a in operands))

    return pl.pallas_call(
        encoder_layer_kernel,
        out_shape=jax.ShapeDtypeStruct((B, S, D), x.dtype),
        in_specs=[vmem] * (1 + len(operands)),
        out_specs=vmem,
        cost_estimate=pl.CostEstimate(
            flops=int(flops),
            transcendentals=int(transcendentals),
            bytes_accessed=int(bytes_accessed),
        ),
    )(x, *operands)


def init_params(key):
    ks = jax.random.split(key, 8)
    std = 0.02
    p = {
        # LayerNorms (PyTorch default: gamma=1, beta=0) — kept 2-D (1, D)
        "ln1_g": jnp.ones((1, EMBED_DIM), jnp.float32),
        "ln1_b": jnp.zeros((1, EMBED_DIM), jnp.float32),
        "ln2_g": jnp.ones((1, EMBED_DIM), jnp.float32),
        "ln2_b": jnp.zeros((1, EMBED_DIM), jnp.float32),
        # Linear weights pre-transposed to [in, out]
        "wq": std * jax.random.normal(ks[0], (EMBED_DIM, EMBED_DIM), jnp.float32),
        "wk": std * jax.random.normal(ks[1], (EMBED_DIM, EMBED_DIM), jnp.float32),
        "wv": std * jax.random.normal(ks[2], (EMBED_DIM, EMBED_DIM), jnp.float32),
        "wo": std * jax.random.normal(ks[3], (EMBED_DIM, EMBED_DIM), jnp.float32),
        "bq": std * jax.random.normal(ks[4], (1, EMBED_DIM), jnp.float32),
        "bk": std * jax.random.normal(ks[5], (1, EMBED_DIM), jnp.float32),
        "bv": std * jax.random.normal(ks[6], (1, EMBED_DIM), jnp.float32),
        "bo": jnp.zeros((1, EMBED_DIM), jnp.float32),
        "w1": std * jax.random.normal(ks[7], (EMBED_DIM, INTERMEDIATE), jnp.float32),
        "b1": jnp.zeros((1, INTERMEDIATE), jnp.float32),
        "w2": std * jax.random.normal(jax.random.fold_in(key, 99),
                                      (INTERMEDIATE, EMBED_DIM), jnp.float32),
        "b2": jnp.zeros((1, EMBED_DIM), jnp.float32),
    }
    return p


def reference_forward(x, p):
    """Pure-JAX fp32 reference mirroring the PyTorch module."""
    def ln(v, g, b):
        mu = jnp.mean(v, axis=-1, keepdims=True)
        var = jnp.mean((v - mu) ** 2, axis=-1, keepdims=True)
        return (v - mu) / jnp.sqrt(var + LN_EPS) * g + b

    B, S, D = x.shape
    residual = x
    h = ln(x, p["ln1_g"][0], p["ln1_b"][0])
    q = h @ p["wq"] + p["bq"][0]
    k = h @ p["wk"] + p["bk"][0]
    v = h @ p["wv"] + p["bv"][0]
    q = q.reshape(B, S, NUM_HEADS, HEAD_DIM).transpose(0, 2, 1, 3)
    k = k.reshape(B, S, NUM_HEADS, HEAD_DIM).transpose(0, 2, 1, 3)
    v = v.reshape(B, S, NUM_HEADS, HEAD_DIM).transpose(0, 2, 1, 3)
    w = jnp.einsum("bhqd,bhkd->bhqk", q, k) * SCALE
    w = jax.nn.softmax(w.astype(jnp.float32), axis=-1)
    o = jnp.einsum("bhqk,bhkd->bhqd", w, v)
    o = o.transpose(0, 2, 1, 3).reshape(B, S, D)
    o = o @ p["wo"] + p["bo"][0]
    h = o + residual
    residual = h
    h2 = ln(h, p["ln2_g"][0], p["ln2_b"][0])
    m = h2 @ p["w1"] + p["b1"][0]
    m = 0.5 * m * (1.0 + jnp.tanh(_SQRT_2_OVER_PI * (m + 0.044715 * m ** 3)))
    m = m @ p["w2"] + p["b2"][0]
    return m + residual


if __name__ == "__main__":
    key = jax.random.PRNGKey(0)
    kx, kpkey = jax.random.split(key)
    x = jax.random.normal(kx, (BATCH, SEQ, EMBED_DIM), jnp.float32)
    params = init_params(kpkey)
    kernel_params = prepare_kernel_params(params)

    out = siglip_encoder_layer(x, kernel_params)
    out = jax.block_until_ready(out)

    ref = reference_forward(x, params)
    assert out.shape == (BATCH, SEQ, EMBED_DIM)
    # bf16 matmul operands + approx reciprocal -> loosened tolerance vs fp32 ref
    max_err = float(jnp.max(jnp.abs(out - ref)))
    assert jnp.allclose(out, ref, atol=2e-2, rtol=2e-2), max_err

    print("KERNEL_OK")
</pallas_src>

<mosaic_0001>
module attributes {stable_mosaic.version = 11 : i64} {
  func.func @encoder_layer_kernel(%arg0: memref<2x16x128xf32, #tpu.memory_space<vmem>>, %arg1: memref<1x128xf32, #tpu.memory_space<vmem>>, %arg2: memref<1x128xf32, #tpu.memory_space<vmem>>, %arg3: memref<128x384xbf16, #tpu.memory_space<vmem>>, %arg4: memref<1x384xf32, #tpu.memory_space<vmem>>, %arg5: memref<128x128xbf16, #tpu.memory_space<vmem>>, %arg6: memref<1x128xf32, #tpu.memory_space<vmem>>, %arg7: memref<1x128xf32, #tpu.memory_space<vmem>>, %arg8: memref<1x128xf32, #tpu.memory_space<vmem>>, %arg9: memref<128x256xbf16, #tpu.memory_space<vmem>>, %arg10: memref<1x256xf32, #tpu.memory_space<vmem>>, %arg11: memref<256x128xbf16, #tpu.memory_space<vmem>>, %arg12: memref<1x128xf32, #tpu.memory_space<vmem>>, %arg13: memref<2x16x128xf32, #tpu.memory_space<vmem>>) attributes {dimension_semantics = [], scalar_prefetch = 0 : i64, scratch_operands = 0 : i64, tpu.core_type = #tpu.core_type<tc>} {
    %c0 = arith.constant 0 : index
    %c0_0 = arith.constant 0 : index
    %c0_1 = arith.constant 0 : index
    %0 = vector.load %arg0[%c0, %c0_0, %c0_1] : memref<2x16x128xf32, #tpu.memory_space<vmem>>, vector<2x16x128xf32>
    %1 = vector.shape_cast %0 : vector<2x16x128xf32> to vector<32x128xf32>
    %c0_2 = arith.constant 0 : index
    %c0_3 = arith.constant 0 : index
    %2 = vector.load %arg1[%c0_2, %c0_3] : memref<1x128xf32, #tpu.memory_space<vmem>>, vector<1x128xf32>
    %c0_4 = arith.constant 0 : index
    %c0_5 = arith.constant 0 : index
    %3 = vector.load %arg2[%c0_4, %c0_5] : memref<1x128xf32, #tpu.memory_space<vmem>>, vector<1x128xf32>
    %cst = arith.constant dense<0.000000e+00> : vector<32xf32>
    %4 = vector.multi_reduction <add>, %1, %cst [1] : vector<32x128xf32> to vector<32xf32>
    %5 = vector.shape_cast %4 : vector<32xf32> to vector<32x1xf32>
    %cst_6 = arith.constant 1.280000e+02 : f32
    %6 = vector.broadcast %cst_6 : f32 to vector<32x1xf32>
    %7 = arith.divf %5, %6 : vector<32x1xf32>
    %8 = vector.broadcast %7 : vector<32x1xf32> to vector<32x128xf32>
    %9 = arith.subf %1, %8 : vector<32x128xf32>
    %10 = vector.broadcast %7 : vector<32x1xf32> to vector<32x128xf32>
    %11 = arith.subf %1, %10 : vector<32x128xf32>
    %12 = arith.mulf %9, %11 : vector<32x128xf32>
    %cst_7 = arith.constant dense<0.000000e+00> : vector<32xf32>
    %13 = vector.multi_reduction <add>, %12, %cst_7 [1] : vector<32x128xf32> to vector<32xf32>
    %14 = vector.shape_cast %13 : vector<32xf32> to vector<32x1xf32>
    %cst_8 = arith.constant 1.280000e+02 : f32
    %15 = vector.broadcast %cst_8 : f32 to vector<32x1xf32>
    %16 = arith.divf %14, %15 : vector<32x1xf32>
    %17 = vector.broadcast %7 : vector<32x1xf32> to vector<32x128xf32>
    %18 = arith.subf %1, %17 : vector<32x128xf32>
    %cst_9 = arith.constant 9.99999997E-7 : f32
    %19 = vector.broadcast %cst_9 : f32 to vector<32x1xf32>
    %20 = arith.addf %16, %19 : vector<32x1xf32>
    %21 = math.rsqrt %20 : vector<32x1xf32>
    %22 = vector.broadcast %21 : vector<32x1xf32> to vector<32x128xf32>
    %23 = arith.mulf %18, %22 : vector<32x128xf32>
    %24 = vector.broadcast %2 : vector<1x128xf32> to vector<32x128xf32>
    %25 = arith.mulf %23, %24 : vector<32x128xf32>
    %26 = vector.broadcast %3 : vector<1x128xf32> to vector<32x128xf32>
    %27 = arith.addf %25, %26 : vector<32x128xf32>
    %28 = arith.truncf %27 : vector<32x128xf32> to vector<32x128xbf16>
    %c0_10 = arith.constant 0 : index
    %c0_11 = arith.constant 0 : index
    %29 = vector.load %arg3[%c0_10, %c0_11] : memref<128x384xbf16, #tpu.memory_space<vmem>>, vector<128x384xbf16>
    %cst_12 = arith.constant dense<0.000000e+00> : vector<32x384xf32>
    %30 = tpu.matmul %28, %29, %cst_12 {dimension_numbers = #tpu.dot_dimension_numbers<[1], [0], [0], [1], [0, 0, 1, 1], [], []>} : vector<32x128xbf16>, vector<128x384xbf16>, vector<32x384xf32> -> vector<32x384xf32>
    %c0_13 = arith.constant 0 : index
    %c0_14 = arith.constant 0 : index
    %31 = vector.load %arg4[%c0_13, %c0_14] : memref<1x384xf32, #tpu.memory_space<vmem>>, vector<1x384xf32>
    %32 = vector.broadcast %31 : vector<1x384xf32> to vector<32x384xf32>
    %33 = arith.addf %30, %32 : vector<32x384xf32>
    %34 = vector.extract_strided_slice %33 {offsets = [0, 0], sizes = [32, 32], strides = [1, 1]} : vector<32x384xf32> to vector<32x32xf32>
    %35 = vector.shape_cast %34 : vector<32x32xf32> to vector<2x16x32xf32>
    %36 = vector.extract_strided_slice %33 {offsets = [0, 32], sizes = [32, 32], strides = [1, 1]} : vector<32x384xf32> to vector<32x32xf32>
    %37 = vector.shape_cast %36 : vector<32x32xf32> to vector<2x16x32xf32>
    %38 = vector.extract_strided_slice %33 {offsets = [0, 64], sizes = [32, 32], strides = [1, 1]} : vector<32x384xf32> to vector<32x32xf32>
    %39 = vector.shape_cast %38 : vector<32x32xf32> to vector<2x16x32xf32>
    %40 = vector.extract_strided_slice %33 {offsets = [0, 96], sizes = [32, 32], strides = [1, 1]} : vector<32x384xf32> to vector<32x32xf32>
    %41 = vector.shape_cast %40 : vector<32x32xf32> to vector<2x16x32xf32>
    %42 = tpu.concatenate %35, %37, %39, %41 in 0 : vector<2x16x32xf32>, vector<2x16x32xf32>, vector<2x16x32xf32>, vector<2x16x32xf32> -> vector<8x16x32xf32>
    %43 = arith.truncf %42 : vector<8x16x32xf32> to vector<8x16x32xbf16>
    %44 = vector.extract_strided_slice %33 {offsets = [0, 128], sizes = [32, 32], strides = [1, 1]} : vector<32x384xf32> to vector<32x32xf32>
    %45 = vector.shape_cast %44 : vector<32x32xf32> to vector<2x16x32xf32>
    %46 = vector.extract_strided_slice %33 {offsets = [0, 160], sizes = [32, 32], strides = [1, 1]} : vector<32x384xf32> to vector<32x32xf32>
    %47 = vector.shape_cast %46 : vector<32x32xf32> to vector<2x16x32xf32>
    %48 = vector.extract_strided_slice %33 {offsets = [0, 192], sizes = [32, 32], strides = [1, 1]} : vector<32x384xf32> to vector<32x32xf32>
    %49 = vector.shape_cast %48 : vector<32x32xf32> to vector<2x16x32xf32>
    %50 = vector.extract_strided_slice %33 {offsets = [0, 224], sizes = [32, 32], strides = [1, 1]} : vector<32x384xf32> to vector<32x32xf32>
    %51 = vector.shape_cast %50 : vector<32x32xf32> to vector<2x16x32xf32>
    %52 = tpu.concatenate %45, %47, %49, %51 in 0 : vector<2x16x32xf32>, vector<2x16x32xf32>, vector<2x16x32xf32>, vector<2x16x32xf32> -> vector<8x16x32xf32>
    %53 = arith.truncf %52 : vector<8x16x32xf32> to vector<8x16x32xbf16>
    %54 = vector.extract_strided_slice %33 {offsets = [0, 256], sizes = [32, 32], strides = [1, 1]} : vector<32x384xf32> to vector<32x32xf32>
    %55 = vector.shape_cast %54 : vector<32x32xf32> to vector<2x16x32xf32>
    %56 = vector.extract_strided_slice %33 {offsets = [0, 288], sizes = [32, 32], strides = [1, 1]} : vector<32x384xf32> to vector<32x32xf32>
    %57 = vector.shape_cast %56 : vector<32x32xf32> to vector<2x16x32xf32>
    %58 = vector.extract_strided_slice %33 {offsets = [0, 320], sizes = [32, 32], strides = [1, 1]} : vector<32x384xf32> to vector<32x32xf32>
    %59 = vector.shape_cast %58 : vector<32x32xf32> to vector<2x16x32xf32>
    %60 = vector.extract_strided_slice %33 {offsets = [0, 352], sizes = [32, 32], strides = [1, 1]} : vector<32x384xf32> to vector<32x32xf32>
    %61 = vector.shape_cast %60 : vector<32x32xf32> to vector<2x16x32xf32>
    %62 = tpu.concatenate %55, %57, %59, %61 in 0 : vector<2x16x32xf32>, vector<2x16x32xf32>, vector<2x16x32xf32>, vector<2x16x32xf32> -> vector<8x16x32xf32>
    %63 = arith.truncf %62 : vector<8x16x32xf32> to vector<8x16x32xbf16>
    "tpu.trace_start"() <{level = 10 : i32, message = "gqd,gkd->gqk"}> : () -> ()
    %cst_15 = arith.constant dense<0.000000e+00> : vector<8x16x16xf32>
    %64 = tpu.matmul %43, %53, %cst_15 {dimension_numbers = #tpu.dot_dimension_numbers<[2], [2], [1], [1], [0, 0, 0, 1, 1, 1], [0], [0]>} : vector<8x16x32xbf16>, vector<8x16x32xbf16>, vector<8x16x16xf32> -> vector<8x16x16xf32>
    "tpu.trace_stop"() : () -> ()
    %cst_16 = arith.constant dense<0xFF800000> : vector<8x16xf32>
    %65 = vector.multi_reduction <maximumf>, %64, %cst_16 [2] : vector<8x16x16xf32> to vector<8x16xf32>
    %66 = vector.shape_cast %65 : vector<8x16xf32> to vector<8x16x1xf32>
    %67 = vector.broadcast %66 : vector<8x16x1xf32> to vector<8x16x16xf32>
    %68 = arith.subf %64, %67 : vector<8x16x16xf32>
    %69 = math.exp %68 : vector<8x16x16xf32>
    %cst_17 = arith.constant dense<0.000000e+00> : vector<8x16xf32>
    %70 = vector.multi_reduction <add>, %69, %cst_17 [2] : vector<8x16x16xf32> to vector<8x16xf32>
    %71 = vector.shape_cast %70 : vector<8x16xf32> to vector<8x16x1xf32>
    %72 = tpu.reciprocal %71 {approx = true} : vector<8x16x1xf32> -> vector<8x16x1xf32>
    %73 = vector.broadcast %72 : vector<8x16x1xf32> to vector<8x16x16xf32>
    %74 = arith.mulf %69, %73 : vector<8x16x16xf32>
    %75 = arith.truncf %74 : vector<8x16x16xf32> to vector<8x16x16xbf16>
    "tpu.trace_start"() <{level = 10 : i32, message = "gqk,gkd->gqd"}> : () -> ()
    %cst_18 = arith.constant dense<0.000000e+00> : vector<8x16x32xf32>
    %76 = tpu.matmul %75, %63, %cst_18 {dimension_numbers = #tpu.dot_dimension_numbers<[2], [1], [1], [2], [0, 0, 0, 1, 1, 2], [0], [0]>} : vector<8x16x16xbf16>, vector<8x16x32xbf16>, vector<8x16x32xf32> -> vector<8x16x32xf32>
    "tpu.trace_stop"() : () -> ()
    %77 = vector.extract_strided_slice %76 {offsets = [0, 0, 0], sizes = [2, 16, 32], strides = [1, 1, 1]} : vector<8x16x32xf32> to vector<2x16x32xf32>
    %78 = vector.shape_cast %77 : vector<2x16x32xf32> to vector<32x32xf32>
    %79 = vector.extract_strided_slice %76 {offsets = [2, 0, 0], sizes = [2, 16, 32], strides = [1, 1, 1]} : vector<8x16x32xf32> to vector<2x16x32xf32>
    %80 = vector.shape_cast %79 : vector<2x16x32xf32> to vector<32x32xf32>
    %81 = vector.extract_strided_slice %76 {offsets = [4, 0, 0], sizes = [2, 16, 32], strides = [1, 1, 1]} : vector<8x16x32xf32> to vector<2x16x32xf32>
    %82 = vector.shape_cast %81 : vector<2x16x32xf32> to vector<32x32xf32>
    %83 = vector.extract_strided_slice %76 {offsets = [6, 0, 0], sizes = [2, 16, 32], strides = [1, 1, 1]} : vector<8x16x32xf32> to vector<2x16x32xf32>
    %84 = vector.shape_cast %83 : vector<2x16x32xf32> to vector<32x32xf32>
    %85 = tpu.concatenate %78, %80, %82, %84 in 1 : vector<32x32xf32>, vector<32x32xf32>, vector<32x32xf32>, vector<32x32xf32> -> vector<32x128xf32>
    %86 = arith.truncf %85 : vector<32x128xf32> to vector<32x128xbf16>
    %c0_19 = arith.constant 0 : index
    %c0_20 = arith.constant 0 : index
    %87 = vector.load %arg5[%c0_19, %c0_20] : memref<128x128xbf16, #tpu.memory_space<vmem>>, vector<128x128xbf16>
    %cst_21 = arith.constant dense<0.000000e+00> : vector<32x128xf32>
    %88 = tpu.matmul %86, %87, %cst_21 {dimension_numbers = #tpu.dot_dimension_numbers<[1], [0], [0], [1], [0, 0, 1, 1], [], []>} : vector<32x128xbf16>, vector<128x128xbf16>, vector<32x128xf32> -> vector<32x128xf32>
    %c0_22 = arith.constant 0 : index
    %c0_23 = arith.constant 0 : index
    %89 = vector.load %arg6[%c0_22, %c0_23] : memref<1x128xf32, #tpu.memory_space<vmem>>, vector<1x128xf32>
    %90 = vector.broadcast %89 : vector<1x128xf32> to vector<32x128xf32>
    %91 = arith.addf %88, %90 : vector<32x128xf32>
    %92 = arith.addf %1, %91 : vector<32x128xf32>
    %c0_24 = arith.constant 0 : index
    %c0_25 = arith.constant 0 : index
    %93 = vector.load %arg7[%c0_24, %c0_25] : memref<1x128xf32, #tpu.memory_space<vmem>>, vector<1x128xf32>
    %c0_26 = arith.constant 0 : index
    %c0_27 = arith.constant 0 : index
    %94 = vector.load %arg8[%c0_26, %c0_27] : memref<1x128xf32, #tpu.memory_space<vmem>>, vector<1x128xf32>
    %cst_28 = arith.constant dense<0.000000e+00> : vector<32xf32>
    %95 = vector.multi_reduction <add>, %92, %cst_28 [1] : vector<32x128xf32> to vector<32xf32>
    %96 = vector.shape_cast %95 : vector<32xf32> to vector<32x1xf32>
    %cst_29 = arith.constant 1.280000e+02 : f32
    %97 = vector.broadcast %cst_29 : f32 to vector<32x1xf32>
    %98 = arith.divf %96, %97 : vector<32x1xf32>
    %99 = vector.broadcast %98 : vector<32x1xf32> to vector<32x128xf32>
    %100 = arith.subf %92, %99 : vector<32x128xf32>
    %101 = vector.broadcast %98 : vector<32x1xf32> to vector<32x128xf32>
    %102 = arith.subf %92, %101 : vector<32x128xf32>
    %103 = arith.mulf %100, %102 : vector<32x128xf32>
    %cst_30 = arith.constant dense<0.000000e+00> : vector<32xf32>
    %104 = vector.multi_reduction <add>, %103, %cst_30 [1] : vector<32x128xf32> to vector<32xf32>
    %105 = vector.shape_cast %104 : vector<32xf32> to vector<32x1xf32>
    %cst_31 = arith.constant 1.280000e+02 : f32
    %106 = vector.broadcast %cst_31 : f32 to vector<32x1xf32>
    %107 = arith.divf %105, %106 : vector<32x1xf32>
    %108 = vector.broadcast %98 : vector<32x1xf32> to vector<32x128xf32>
    %109 = arith.subf %92, %108 : vector<32x128xf32>
    %cst_32 = arith.constant 9.99999997E-7 : f32
    %110 = vector.broadcast %cst_32 : f32 to vector<32x1xf32>
    %111 = arith.addf %107, %110 : vector<32x1xf32>
    %112 = math.rsqrt %111 : vector<32x1xf32>
    %113 = vector.broadcast %112 : vector<32x1xf32> to vector<32x128xf32>
    %114 = arith.mulf %109, %113 : vector<32x128xf32>
    %115 = vector.broadcast %93 : vector<1x128xf32> to vector<32x128xf32>
    %116 = arith.mulf %114, %115 : vector<32x128xf32>
    %117 = vector.broadcast %94 : vector<1x128xf32> to vector<32x128xf32>
    %118 = arith.addf %116, %117 : vector<32x128xf32>
    %119 = arith.truncf %118 : vector<32x128xf32> to vector<32x128xbf16>
    %c0_33 = arith.constant 0 : index
    %c0_34 = arith.constant 0 : index
    %120 = vector.load %arg9[%c0_33, %c0_34] : memref<128x256xbf16, #tpu.memory_space<vmem>>, vector<128x256xbf16>
    %cst_35 = arith.constant dense<0.000000e+00> : vector<32x256xf32>
    %121 = tpu.matmul %119, %120, %cst_35 {dimension_numbers = #tpu.dot_dimension_numbers<[1], [0], [0], [1], [0, 0, 1, 1], [], []>} : vector<32x128xbf16>, vector<128x256xbf16>, vector<32x256xf32> -> vector<32x256xf32>
    %c0_36 = arith.constant 0 : index
    %c0_37 = arith.constant 0 : index
    %122 = vector.load %arg10[%c0_36, %c0_37] : memref<1x256xf32, #tpu.memory_space<vmem>>, vector<1x256xf32>
    %123 = vector.broadcast %122 : vector<1x256xf32> to vector<32x256xf32>
    %124 = arith.addf %121, %123 : vector<32x256xf32>
    %cst_38 = arith.constant 4.471500e-02 : f32
    %125 = vector.broadcast %cst_38 : f32 to vector<32x256xf32>
    %126 = arith.mulf %125, %124 : vector<32x256xf32>
    %127 = arith.mulf %126, %124 : vector<32x256xf32>
    %128 = arith.mulf %127, %124 : vector<32x256xf32>
    %129 = arith.addf %124, %128 : vector<32x256xf32>
    %cst_39 = arith.constant 0.797884583 : f32
    %130 = vector.broadcast %cst_39 : f32 to vector<32x256xf32>
    %131 = arith.mulf %130, %129 : vector<32x256xf32>
    %cst_40 = arith.constant 5.000000e-01 : f32
    %132 = vector.broadcast %cst_40 : f32 to vector<32x256xf32>
    %133 = arith.mulf %132, %124 : vector<32x256xf32>
    %134 = math.tanh %131 : vector<32x256xf32>
    %cst_41 = arith.constant 1.000000e+00 : f32
    %135 = vector.broadcast %cst_41 : f32 to vector<32x256xf32>
    %136 = arith.addf %135, %134 : vector<32x256xf32>
    %137 = arith.mulf %133, %136 : vector<32x256xf32>
    %138 = arith.truncf %137 : vector<32x256xf32> to vector<32x256xbf16>
    %c0_42 = arith.constant 0 : index
    %c0_43 = arith.constant 0 : index
    %139 = vector.load %arg11[%c0_42, %c0_43] : memref<256x128xbf16, #tpu.memory_space<vmem>>, vector<256x128xbf16>
    %cst_44 = arith.constant dense<0.000000e+00> : vector<32x128xf32>
    %140 = tpu.matmul %138, %139, %cst_44 {dimension_numbers = #tpu.dot_dimension_numbers<[1], [0], [0], [1], [0, 0, 1, 1], [], []>} : vector<32x256xbf16>, vector<256x128xbf16>, vector<32x128xf32> -> vector<32x128xf32>
    %c0_45 = arith.constant 0 : index
    %c0_46 = arith.constant 0 : index
    %141 = vector.load %arg12[%c0_45, %c0_46] : memref<1x128xf32, #tpu.memory_space<vmem>>, vector<1x128xf32>
    %142 = vector.broadcast %141 : vector<1x128xf32> to vector<32x128xf32>
    %143 = arith.addf %140, %142 : vector<32x128xf32>
    %144 = arith.addf %92, %143 : vector<32x128xf32>
    %145 = vector.shape_cast %144 : vector<32x128xf32> to vector<2x16x128xf32>
    %c0_47 = arith.constant 0 : index
    %c0_48 = arith.constant 0 : index
    %c0_49 = arith.constant 0 : index
    %146 = vector.load %arg13[%c0_47, %c0_48, %c0_49] : memref<2x16x128xf32, #tpu.memory_space<vmem>>, vector<2x16x128xf32>
    tpu.vector_store %arg13[%c0_47, %c0_48, %c0_49], %145 {strides = array<i32>} : memref<2x16x128xf32, #tpu.memory_space<vmem>>, vector<2x16x128xf32>,
    return
  }
}

</mosaic_0001>

<bundles_post_ra>
// kernel: tpu_custom_call.1
= control target key start
LH: loop header
LB: loop body
LE: loop exit
PB: predicated region body
PF: predicated region fallthrough
CT: control target
= control target key end

     0   :  { %18 = vsyncpa [#allocation3], 0  ;;  %s3283_s0 = inlined_call_operand.hbm [shape: f32[2,16,128], index: 0, kind: input, shape index: {}]   ;;  %s3284_s1 = inlined_call_operand.hbm [shape: f32[1,128], index: 1, kind: input, shape index: {}]   ;;  %s3285_s2 = inlined_call_operand.hbm [shape: f32[1,128], index: 2, kind: input, shape index: {}]   ;;  %s3286_s3 = inlined_call_operand.hbm [shape: bf16[128,384], index: 3, kind: input, shape index: {}]   ;;  %s3287_s4 = inlined_call_operand.vmem [shape: f32[1,384], index: 4, kind: input, shape index: {}]   ;;  %s3288_s5 = inlined_call_operand.hbm [shape: bf16[128,128], index: 5, kind: input, shape index: {}]   ;;  %s3289_s6 = inlined_call_operand.hbm [shape: f32[1,128], index: 6, kind: input, shape index: {}]   ;;  %s3290_s7 = inlined_call_operand.vmem [shape: f32[1,128], index: 7, kind: input, shape index: {}]   ;;  %s3291_s8 = inlined_call_operand.vmem [shape: f32[1,128], index: 8, kind: input, shape index: {}]   ;;  %s3292_s9 = inlined_call_operand.hbm [shape: bf16[128,256], index: 9, kind: input, shape index: {}]   ;;  %s3293_s10 = inlined_call_operand.vmem [shape: f32[1,256], index: 10, kind: input, shape index: {}]   ;;  %s3294_s11 = inlined_call_operand.hbm [shape: bf16[256,128], index: 11, kind: input, shape index: {}]   ;;  %s3295_s12 = inlined_call_operand.vmem [shape: f32[1,128], index: 12, kind: input, shape index: {}]   ;;  %s3296_s13 = inlined_call_operand.hbm [shape: f32[2,16,128], index: 13, kind: output, shape index: {}]  }
   0x1   :  { %19 = vsyncpa [#allocation6], 0 }
   0x2   :  { %20 = vsyncpa [#allocation9], 0 }
   0x3   :  { %21 = vsyncpa [#allocation12], 0 }
   0x4   :  { %22 = vsyncpa [#allocation15], 0  ;;  %s42_s27 = sshll.u32 %s3284_s1, 4  ;;  %s43_s27 = int_to_ptr.hbm [resolvable:$true] %s42_s27 }
   0x5   :  { %23 = vsyncpa [#allocation4], 0  ;;  %s2805_s28 = smov [#allocation5]   ;;  %s63_s15 = sshll.u32 %s3286_s3, 4  ;;  %s64_s15 = int_to_ptr.hbm [resolvable:$true] %s63_s15 }
   0x6   :  { %s44_s29 = sshll.u32 %s2805_s28, 4  ;;  %s2806_s16 = smov [#allocation8]   ;;  %s45_s29 = int_to_ptr.vmem [resolvable:$true] %s44_s29 }
   0x7   :  { %47 = dma.hbm_to_vmem [thread:$0]  %s43_s27, 16, %s45_s29, [#allocation6]  }
   0x8   :  { %s65_s17 = sshll.u32 %s2806_s16, 4  ;;  %s2807_s18 = smov 192   ;;  %s66_s17 = int_to_ptr.vmem [resolvable:$true] %s65_s17 }
   0x9   :  { %s2808_s19 = smov 12   ;;  %s92_s1 = sshll.u32 %s3289_s6, 4  ;;  %s93_s1 = int_to_ptr.hbm [resolvable:$true] %s92_s1 }
   0xa   :  { %71 = dma.hbm_to_vmem [thread:$0]  %s64_s15, 3072, %s66_s17, [#allocation9], %s2807_s18, %s2807_s18, %s2808_s19  }
   0xb   :  { %s2809_s22 = smov [#allocation11]   ;;  %s28_s3 = sshll.u32 %s3283_s0, 4  ;;  %s29_s3 = int_to_ptr.hbm [resolvable:$true] %s28_s3 }
   0xc   :  { %s94_s23 = sshll.u32 %s2809_s22, 4  ;;  %s2810_s26 = smov [#allocation2]   ;;  %s95_s23 = int_to_ptr.vmem [resolvable:$true] %s94_s23 }
   0xd   :  { %97 = dma.hbm_to_vmem [thread:$0]  %s93_s1, 16, %s95_s23, [#allocation12]  }
   0xe   :  { %s30_s27 = sshll.u32 %s2810_s26, 4  ;;  %s2811_s28 = smov 128   ;;  %s31_s27 = int_to_ptr.vmem [resolvable:$true] %s30_s27 }
   0xf   :  { %s2812_s29 = smov 8   ;;  %s53_s14 = sshll.u32 %s3285_s2, 4  ;;  %s54_s14 = int_to_ptr.hbm [resolvable:$true] %s53_s14 }
  0x10   :  { %36 = dma.hbm_to_vmem [thread:$0]  %s29_s3, 512, %s31_s27, [#allocation3], %s2811_s28, %s2811_s28, %s2812_s29  }
  0x11   :  { %s2813_s15 = smov [#allocation7]   ;;  %s78_s18 = sshll.u32 %s3288_s5, 4  ;;  %s79_s18 = int_to_ptr.hbm [resolvable:$true] %s78_s18 }
  0x12   :  { %s55_s16 = sshll.u32 %s2813_s15, 4  ;;  %s2814_s19 = smov [#allocation10]   ;;  %s56_s16 = int_to_ptr.vmem [resolvable:$true] %s55_s16 }
  0x13   :  { %58 = dma.hbm_to_vmem [thread:$0]  %s54_s14, 16, %s56_s16, [#allocation6]  }
  0x14   :  { %s80_s20 = sshll.u32 %s2814_s19, 4  ;;  %s2815_s21 = smov 64   ;;  %s81_s20 = int_to_ptr.vmem [resolvable:$true] %s80_s20 }
  0x15   :  { %s2816_s1 = smov 4   ;;  %s106_s23 = sshll.u32 %s3292_s9, 4  ;;  %s107_s23 = int_to_ptr.hbm [resolvable:$true] %s106_s23 }
  0x16   :  { %86 = dma.hbm_to_vmem [thread:$0]  %s79_s18, 1024, %s81_s20, [#allocation9], %s2815_s21, %s2815_s21, %s2816_s1  }
  0x17   :  { %s2817_s24 = smov [#allocation13]   ;;  %s121_s26 = sshll.u32 %s3294_s11, 4  ;;  %s122_s26 = int_to_ptr.hbm [resolvable:$true] %s121_s26 }
  0x18   :  { %s108_s25 = sshll.u32 %s2817_s24, 4  ;;  %s2818_s27 = smov [#allocation14]   ;;  %s109_s25 = int_to_ptr.vmem [resolvable:$true] %s108_s25 }
  0x19   :  { %114 = dma.hbm_to_vmem [thread:$0]  %s107_s23, 2048, %s109_s25, [#allocation12], %s2811_s28, %s2811_s28, %s2812_s29  }
  0x1a   :  { %s123_s6 = sshll.u32 %s2818_s27, 4  ;;  %s124_s6 = int_to_ptr.vmem [resolvable:$true] %s123_s6 }
  0x1b   :  { %129 = dma.hbm_to_vmem [thread:$0]  %s122_s26, 2048, %s124_s6, [#allocation15], %s2815_s21, %s2815_s21, %s2816_s1  }
  0x1c   :  { %2793 = dma.done.wait [#allocation3], 512  }
  0x1d   :  { %2794 = vsyncadd [#allocation3], 4294966784 }
  0x1e   :  { %2795 = dma.done.wait [#allocation6], 32  }
  0x1f   :  { %2796 = vsyncadd [#allocation6], 4294967264 }
  0x20   :  { %2797 = dma.done.wait [#allocation9], 4096  }
  0x21   :  { %2798 = vsyncadd [#allocation9], 4294963200 }
  0x22   :  { %2799 = dma.done.wait [#allocation12], 2064  }
  0x23   :  { %2800 = vsyncadd [#allocation12], 4294965232 }
  0x24   :  { %2801 = dma.done.wait [#allocation15], 2048  }
  0x25   :  { %2802 = vsyncadd [#allocation15], 4294965248  ;;  %v167_v0 = vld [vmem:[#allocation2 + $0x10] sm:$0xff]  ;;  %v165_v1 = vld [vmem:[#allocation2] sm:$0xff]  ;;  %v2819_v4 = vmov 128.0   ;;  %s2820_s30 = smov 96  }
  0x26   :  { %175 = vadd.xlane.f32.xlu1 %v167_v0  ;;  %171 = vadd.xlane.f32.xlu0 %v165_v1  ;;  %v168_v2 = vld [vmem:[#allocation2 + $0x18] sm:$0xff]  ;;  %v166_v3 = vld [vmem:[#allocation2 + $0x8] sm:$0xff]  ;;  %2475 = vrcp.f32 %v2819_v4  ;;  %v2288_v29 = vld [vmem:[#allocation8 + $0xac] sm:$0xf]  ;;  %vm677_vm13 = vcmask 261120   ;;  %vm908_vm14 = vcmask 130048  }
  0x27   :  { %v2081_v27 = vld [vmem:[#allocation8 + $0xa8] sm:$0xf]  ;;  %v2289_v28 = vld [vmem:[#allocation8 + $0xb0] sm:$0xf0]  ;;  %v2083_v31 = vld [vmem:[#allocation8 + $0xb4] sm:$0xf0] }
  0x28   :  { %v2082_v30 = vor.u32 %v2289_v28, %v2081_v27  ;;  %v2089_v32 = vld [vmem:[#allocation8 + $0xb0] sm:$0xf]  ;;  %v2290_v33 = vld [vmem:[#allocation8 + $0xb8] sm:$0xf0]  ;;  %v2086_v34 = vor.u32 %v2288_v29, %v2083_v31  ;;  %v2285_v38 = vld [vmem:[#allocation8 + $0x94] sm:$0xf] }
  0x29   :  { %v2090_v35 = vor.u32 %v2290_v33, %v2089_v32  ;;  %v2069_v36 = vld [vmem:[#allocation8 + $0x90] sm:$0xf]  ;;  %v2286_v37 = vld [vmem:[#allocation8 + $0x98] sm:$0xf0]  ;;  %v2071_v40 = vld [vmem:[#allocation8 + $0x9c] sm:$0xf0] }
  0x2a   :  { %442 = vmatpush.bf16.msra.mxu0 %v2082_v30  ;;  %461 = vmatpush.bf16.msra.mxu1 %v2086_v34  ;;  %v2070_v39 = vor.u32 %v2286_v37, %v2069_v36  ;;  %v2077_v41 = vld [vmem:[#allocation8 + $0x98] sm:$0xf]  ;;  %v2287_v42 = vld [vmem:[#allocation8 + $0xa0] sm:$0xf0]  ;;  %v2074_v43 = vor.u32 %v2285_v38, %v2071_v40  ;;  %v2282_v47 = vld [vmem:[#allocation8 + $0x7c] sm:$0xf] }
  0x2b   :  { %480 = vmatpush.bf16.msra.mxu2 %v2090_v35  ;;  %v2078_v44 = vor.u32 %v2287_v42, %v2077_v41  ;;  %v2057_v45 = vld [vmem:[#allocation8 + $0x78] sm:$0xf]  ;;  %v2283_v46 = vld [vmem:[#allocation8 + $0x80] sm:$0xf0]  ;;  %v2059_v49 = vld [vmem:[#allocation8 + $0x84] sm:$0xf0] }
  0x2c   :  { %v2476_v5 = vpop.eup %2475  ;;  %v2058_v48 = vor.u32 %v2283_v46, %v2057_v45  ;;  %v2065_v50 = vld [vmem:[#allocation8 + $0x80] sm:$0xf]  ;;  %v2284_v51 = vld [vmem:[#allocation8 + $0x88] sm:$0xf0]  ;;  %v2062_v52 = vor.u32 %v2282_v47, %v2059_v49  ;;  %v2279_v56 = vld [vmem:[#allocation8 + $0x64] sm:$0xf] }
  0x2d   :  { %v180_v6 = vmul.f32 128.0, %v2476_v5  ;;  %vm184_vm0 = vweird.f32 %v2476_v5  ;;  %v2066_v53 = vor.u32 %v2284_v51, %v2065_v50  ;;  %v2045_v54 = vld [vmem:[#allocation8 + $0x60] sm:$0xf]  ;;  %v2280_v55 = vld [vmem:[#allocation8 + $0x68] sm:$0xf0]  ;;  %vm1377_vm15 = vcmask 523264  }
  0x2e   :  { %177 = vadd.xlane.f32.xlu1 %v168_v2  ;;  %173 = vadd.xlane.f32.xlu0 %v166_v3  ;;  %v2046_v57 = vor.u32 %v2280_v55, %v2045_v54  ;;  %v2047_v58 = vld [vmem:[#allocation8 + $0x6c] sm:$0xf0]  ;;  %v2053_v59 = vld [vmem:[#allocation8 + $0x68] sm:$0xf]  ;;  %v2281_v60 = vld [vmem:[#allocation8 + $0x70] sm:$0xf0] }
  0x2f   :  { %v181_v7 = vsub.f32 1.0, %v180_v6  ;;  %443 = vmatpush.bf16.msra.mxu0 %v2070_v39  ;;  %462 = vmatpush.bf16.msra.mxu1 %v2074_v43  ;;  %v2050_v61 = vor.u32 %v2279_v56, %v2047_v58  ;;  %v2054_v62 = vor.u32 %v2281_v60, %v2053_v59  ;;  %v2033_v63 = vld [vmem:[#allocation8 + $0x48] sm:$0xf]  ;;  %v2041_v4 = vld [vmem:[#allocation8 + $0x50] sm:$0xf] }
  0x30   :  { %481 = vmatpush.bf16.msra.mxu2 %v2078_v44  ;;  %v2017_v27 = vld [vmem:[#allocation8 + $0x20] sm:$0xf]  ;;  %v2272_v28 = vld [vmem:[#allocation8 + $0x28] sm:$0xf0]  ;;  %v2267_v34 = vld [vmem:[#allocation8 + $0x4] sm:$0xf] }
  0x31   :  { %v182_v8 = vmul.f32 %v2476_v5, %v181_v7  ;;  %v2018_v31 = vor.u32 %v2272_v28, %v2017_v27  ;;  %v1997_v32 = vld [vmem:[#allocation8] sm:$0xf]  ;;  %v2268_v33 = vld [vmem:[#allocation8 + $0x8] sm:$0xf0]  ;;  %v1999_v38 = vld [vmem:[#allocation8 + $0xc] sm:$0xf0] }
  0x32   :  { %v1998_v37 = vor.u32 %v2268_v33, %v1997_v32  ;;  %v2005_v39 = vld [vmem:[#allocation8 + $0x8] sm:$0xf]  ;;  %v2269_v40 = vld [vmem:[#allocation8 + $0x10] sm:$0xf0]  ;;  %v2002_v41 = vor.u32 %v2267_v34, %v1999_v38 }
  0x33   :  { %v183_v9 = vadd.f32 %v2476_v5, %v182_v8  ;;  %444 = vmatpush.bf16.msra.mxu0 %v2058_v48  ;;  %463 = vmatpush.bf16.msra.mxu1 %v2062_v52  ;;  %v2021_v8 = vld [vmem:[#allocation8 + $0x30] sm:$0xf]  ;;  %v2006_v42 = vor.u32 %v2269_v40, %v2005_v39 }
  0x34   :  { %482 = vmatpush.bf16.msra.mxu2 %v2066_v53 }
  0x35   :  { %v2927_v10 = vsel %vm184_vm0, %v2476_v5, %v183_v9  ;;  %v2278_v5 = vld [vmem:[#allocation8 + $0x58] sm:$0xf0]  ;;  %vm1382_vm0 = vcmask 785408  }
  0x36   :  { %v2042_v7 = vor.u32 %v2278_v5, %v2041_v4  ;;  %v2274_v9 = vld [vmem:[#allocation8 + $0x38] sm:$0xf0] }
  0x37   :  { %445 = vmatpush.bf16.msra.mxu0 %v2046_v57  ;;  %464 = vmatpush.bf16.msra.mxu1 %v2050_v61 }
  0x38   :  { %483 = vmatpush.bf16.msra.mxu2 %v2054_v62 }
  0x3c   :  { %484 = vmatpush.bf16.msra.mxu2 %v2042_v7 }
  0x99   :  { %v176_v11 = vpop.xlane.xlu1 %175  ;;  %v172_v12 = vpop.xlane.xlu0 %171 }
  0x9a   :  { %v188_v13 = vmul.f32 %v2927_v10, %v176_v11  ;;  %v186_v14 = vmul.f32 %v2927_v10, %v172_v12  ;;  %v2273_v11 = vld [vmem:[#allocation8 + $0x34] sm:$0xf]  ;;  %v2022_v12 = vor.u32 %v2274_v9, %v2021_v8  ;;  %v2469_v8 = vld [vmem:[#allocation5] ss:$0 sm:$0xff] }
  0x9c   :  { %v2931_v15 = vsub.f32 %v167_v0, %v188_v13  ;;  %v2933_v16 = vsub.f32 %v165_v1, %v186_v14  ;;  %v2277_v0 = vld [vmem:[#allocation8 + $0x50] sm:$0xf0]  ;;  %v2276_v1 = vld [vmem:[#allocation8 + $0x4c] sm:$0xf]  ;;  %v2023_v13 = vld [vmem:[#allocation8 + $0x3c] sm:$0xf0] }
  0x9d   :  { %v2029_v14 = vld [vmem:[#allocation8 + $0x38] sm:$0xf] }
  0x9e   :  { %v196_v17 = vmul.f32 %v2931_v15, %v2931_v15  ;;  %v194_v18 = vmul.f32 %v2933_v16, %v2933_v16 }
  0xa0   :  { %202 = vadd.xlane.f32.xlu0 %v196_v17  ;;  %198 = vadd.xlane.f32.xlu2 %v194_v18  ;;  %v2275_v17 = vld [vmem:[#allocation8 + $0x40] sm:$0xf0]  ;;  %v2026_v18 = vor.u32 %v2273_v11, %v2023_v13 }
  0xa1   :  { %v178_v19 = vpop.xlane.xlu1 %177  ;;  %v174_v20 = vpop.xlane.xlu0 %173 }
  0xa2   :  { %v189_v21 = vmul.f32 %v2927_v10, %v178_v19  ;;  %v187_v22 = vmul.f32 %v2927_v10, %v174_v20  ;;  %v2030_v19 = vor.u32 %v2275_v17, %v2029_v14  ;;  %v2009_v20 = vld [vmem:[#allocation8 + $0x18] sm:$0xf] }
  0xa4   :  { %v2941_v23 = vsub.f32 %v168_v2, %v189_v21  ;;  %v2943_v24 = vsub.f32 %v166_v3, %v187_v22  ;;  %v2034_v2 = vor.u32 %v2277_v0, %v2033_v63  ;;  %v2035_v3 = vld [vmem:[#allocation8 + $0x54] sm:$0xf0]  ;;  %485 = vmatpush.bf16.msra.mxu2 %v2030_v19  ;;  %v2271_v21 = vld [vmem:[#allocation8 + $0x20] sm:$0xf0]  ;;  %v2270_v22 = vld [vmem:[#allocation8 + $0x1c] sm:$0xf] }
  0xa5   :  { %v2038_v6 = vor.u32 %v2276_v1, %v2035_v3 }
  0xa6   :  { %v197_v25 = vmul.f32 %v2941_v23, %v2941_v23  ;;  %v195_v26 = vmul.f32 %v2943_v24, %v2943_v24  ;;  %446 = vmatpush.bf16.msra.mxu0 %v2034_v2 }
  0xa7   :  { %465 = vmatpush.bf16.msra.mxu1 %v2038_v6 }
  0xa8   :  { %204 = vadd.xlane.f32.xlu1 %v197_v25  ;;  %200 = vadd.xlane.f32.xlu2 %v195_v26  ;;  %v2010_v25 = vor.u32 %v2271_v21, %v2009_v20  ;;  %v2011_v26 = vld [vmem:[#allocation8 + $0x24] sm:$0xf0] }
  0xa9   :  { %v2014_v30 = vor.u32 %v2270_v22, %v2011_v26  ;;  %486 = vmatpush.bf16.msra.mxu2 %v2018_v31 }
  0xaa   :  { %447 = vmatpush.bf16.msra.mxu0 %v2022_v12 }
  0xab   :  { %466 = vmatpush.bf16.msra.mxu1 %v2026_v18  ;;  %v2470_v18 = vld [vmem:[#allocation7] ss:$0 sm:$0xff] }
  0xad   :  { %487 = vmatpush.bf16.msra.mxu2 %v2006_v42 }
  0xae   :  { %448 = vmatpush.bf16.msra.mxu0 %v2010_v25 }
  0xaf   :  { %467 = vmatpush.bf16.msra.mxu1 %v2014_v30 }
  0xb2   :  { %449 = vmatpush.bf16.msra.mxu0 %v1998_v37 }
  0xb3   :  { %468 = vmatpush.bf16.msra.mxu1 %v2002_v41 }
 0x113   :  { %v199_v29 = vpop.xlane.xlu2 %198  ;;  %v203_v36 = vpop.xlane.xlu0 %202 }
 0x114   :  { %v206_v35 = vmul.f32 %v199_v29, %v2927_v10  ;;  %v208_v44 = vmul.f32 %v203_v36, %v2927_v10 }
 0x116   :  { %v210_v43 = vadd.f32 1e-06, %v206_v35  ;;  %v212_v45 = vadd.f32 1e-06, %v208_v44  ;;  %v306_v35 = vld [vmem:[%s3287_s4] sm:$0x7] }
 0x117   :  { %v309_v38 = vperm.slane %v306_v35, 1  ;;  %v308_v39 = vperm.slane %v306_v35, 0  ;;  %v310_v41 = vperm.slane %v306_v35, 2  ;;  %s2821_s4 = smov 32  }
 0x118   :  { %2477 = vrsqrt.f32 %v210_v43  ;;  %vm220_vm2 = vweird.f32 %v210_v43  ;;  %vm240_vm9 = vweird.f32 %v212_v45 }
 0x119   :  { %2479 = vrsqrt.f32 %v212_v45 }
 0x11b   :  { %v205_v46 = vpop.xlane.xlu1 %204  ;;  %v201_v47 = vpop.xlane.xlu2 %200 }
 0x11c   :  { %v209_v48 = vmul.f32 %v205_v46, %v2927_v10  ;;  %v207_v49 = vmul.f32 %v201_v47, %v2927_v10 }
 0x11e   :  { %v2478_v50 = vpop.eup %2477  ;;  %v213_v51 = vadd.f32 1e-06, %v209_v48  ;;  %v211_v52 = vadd.f32 1e-06, %v207_v49 }
 0x11f   :  { %v215_v53 = vmul.f32 %v2478_v50, %v210_v43  ;;  %v2480_v56 = vpop.eup %2479  ;;  %vm221_vm1 = vweird.f32 %v2478_v50 }
 0x120   :  { %2481 = vrsqrt.f32 %v213_v51  ;;  %v235_v62 = vmul.f32 %v2480_v56, %v212_v45  ;;  %vm222_vm3 = vmor %vm220_vm2, %vm221_vm1  ;;  %vm230_vm5 = vweird.f32 %v211_v52  ;;  %vm250_vm7 = vweird.f32 %v213_v51 }
 0x121   :  { %v216_v54 = vmul.f32 %v2478_v50, %v215_v53  ;;  %2483 = vrsqrt.f32 %v211_v52  ;;  %vm241_vm10 = vweird.f32 %v2480_v56 }
 0x122   :  { %v236_v3 = vmul.f32 %v2480_v56, %v235_v62  ;;  %vm242_vm12 = vmor %vm240_vm9, %vm241_vm10 }
 0x123   :  { %v217_v55 = vmul.f32 0.5, %v216_v54 }
 0x124   :  { %v237_v9 = vmul.f32 0.5, %v236_v3 }
 0x125   :  { %v218_v57 = vsub.f32 1.5, %v217_v55 }
 0x126   :  { %v2482_v58 = vpop.eup %2481  ;;  %v238_v19 = vsub.f32 1.5, %v237_v9 }
 0x127   :  { %v2484_v59 = vpop.eup %2483  ;;  %v245_v60 = vmul.f32 %v2482_v58, %v213_v51  ;;  %v219_v61 = vmul.f32 %v2478_v50, %v218_v57  ;;  %vm251_vm8 = vweird.f32 %v2482_v58 }
 0x128   :  { %v225_v63 = vmul.f32 %v2484_v59, %v211_v52  ;;  %vm231_vm4 = vweird.f32 %v2484_v59  ;;  %vm252_vm11 = vmor %vm250_vm7, %vm251_vm8  ;;  %v239_v25 = vmul.f32 %v2480_v56, %v238_v19 }
 0x129   :  { %v246_v0 = vmul.f32 %v2482_v58, %v245_v60  ;;  %v223_v2 = vsel %vm222_vm3, %v2478_v50, %v219_v61  ;;  %vm232_vm6 = vmor %vm230_vm5, %vm231_vm4 }
 0x12a   :  { %v226_v1 = vmul.f32 %v2484_v59, %v225_v63  ;;  %v254_v7 = vmul.f32 %v223_v2, %v2933_v16  ;;  %v243_v28 = vsel %vm242_vm12, %v2480_v56, %v239_v25 }
 0x12b   :  { %v247_v5 = vmul.f32 0.5, %v246_v0  ;;  %v256_v29 = vmul.f32 %v243_v28, %v2931_v15 }
 0x12c   :  { %v227_v4 = vmul.f32 0.5, %v226_v1  ;;  %v261_v17 = vmul.f32 %v2469_v8, %v254_v7 }
 0x12d   :  { %v248_v12 = vsub.f32 1.5, %v247_v5  ;;  %v263_v31 = vmul.f32 %v2469_v8, %v256_v29 }
 0x12e   :  { %v228_v6 = vsub.f32 1.5, %v227_v4  ;;  %v268_v16 = vadd.f32 %v2470_v18, %v261_v17 }
 0x12f   :  { %v249_v21 = vmul.f32 %v2482_v58, %v248_v12  ;;  %v270_v33 = vadd.f32 %v2470_v18, %v263_v31 }
 0x130   :  { %v229_v11 = vmul.f32 %v2484_v59, %v228_v6 }
 0x131   :  { %v253_v27 = vsel %vm252_vm11, %v2482_v58, %v249_v21 }
 0x132   :  { %v233_v13 = vsel %vm232_vm6, %v2484_v59, %v229_v11 }
 0x133   :  { %v255_v14 = vmul.f32 %v233_v13, %v2943_v24  ;;  %v257_v24 = vmul.f32 %v253_v27, %v2941_v23 }
 0x135   :  { %v262_v20 = vmul.f32 %v2469_v8, %v255_v14  ;;  %v264_v30 = vmul.f32 %v2469_v8, %v257_v24 }
 0x137   :  { %v269_v22 = vadd.f32 %v2470_v18, %v262_v20  ;;  %v271_v32 = vadd.f32 %v2470_v18, %v264_v30 }
 0x139   :  { %v272_v26 = vpack.c.bf16 %v269_v22, %v268_v16  ;;  %v273_v34 = vpack.c.bf16 %v271_v32, %v270_v33 }
 0x13b   :  { %450 = vmatmul.bf16.vlgmr.msra.gmra.mxu0 %v272_v26  ;;  %469 = vmatmul.bf16.vlgmr.msra.gmra.mxu1 %v272_v26 }
 0x13c   :  { %488 = vmatmul.bf16.vlgmr.msra.gmra.mxu2 %v272_v26 }
 0x14b   :  { %455 = vmatmul.bf16.gmra.mxu0 %v273_v34  ;;  %474 = vmatmul.bf16.gmra.mxu1 %v273_v34 }
 0x14c   :  { %493 = vmatmul.bf16.gmra.mxu2 %v273_v34 }
 0x1b8   :  { %v451_v36 = vpop.f32.mrf.mxu0  ;;  %v470_v37 = vpop.f32.mrf.mxu1 }
 0x1b9   :  { %v471_v40 = vadd.f32 %v470_v37, %v309_v38  ;;  %v452_v43 = vadd.f32 %v451_v36, %v308_v39 }
 0x1bb   :  { %v595_v46 = vpack.c.bf16 %v471_v40, %v471_v40  ;;  %v539_v61 = vpack.c.bf16 %v452_v43, %v452_v43 }
 0x1bd   :  { %v674_v51 = vunpack.c.l.b16 %v595_v46  ;;  %v669_v4 = vunpack.c.l.b16 %v539_v61 }
 0x1bf   :  { %v489_v23 = vpop.f32.mrf.mxu2 }
 0x1c0   :  { %v453_v15 = vpop.f32.mrf.mxu0  ;;  %v472_v42 = vpop.f32.mrf.mxu1  ;;  %v490_v50 = vadd.f32 %v489_v23, %v310_v41 }
 0x1c1   :  { %v454_v44 = vadd.f32 %v453_v15, %v308_v39  ;;  %v473_v45 = vadd.f32 %v472_v42, %v309_v38 }
 0x1c2   :  { %v651_v59 = vpack.c.bf16 %v490_v50, %v490_v50 }
 0x1c3   :  { %v2349_v47 = vpack.i.bf16 %v473_v45, %v471_v40  ;;  %v2354_v48 = vpack.i.bf16 %v454_v44, %v452_v43  ;;  %v596_v49 = vpack.c.bf16 %v473_v45, %v473_v45  ;;  %v540_v55 = vpack.c.bf16 %v454_v44, %v454_v44 }
 0x1c4   :  { %v1108_v1 = vunpack.c.l.b16 %v651_v59 }
 0x1c5   :  { %2350 = vrot.lane.b32.xlu2 %v2349_v47, %s2820_s30  ;;  %2355 = vrot.lane.b32.xlu0 %v2354_v48, %s2820_s30  ;;  %v675_v52 = vunpack.c.l.b16 %v596_v49  ;;  %v670_v0 = vunpack.c.l.b16 %v540_v55 }
 0x1c7   :  { %v491_v53 = vpop.f32.mrf.mxu2  ;;  %v676_v54 = vpack.c.b16 %v675_v52, %v674_v51  ;;  %v671_v7 = vpack.c.b16 %v670_v0, %v669_v4 }
 0x1c8   :  { %v492_v56 = vadd.f32 %v491_v53, %v310_v41  ;;  %v456_v57 = vpop.f32.mrf.mxu0  ;;  %v475_v58 = vpop.f32.mrf.mxu1 }
 0x1c9   :  { %v682_v60 = vsel %vm677_vm13, %v676_v54, 0  ;;  %v476_v3 = vadd.f32 %v475_v58, %v309_v38  ;;  %v457_v11 = vadd.f32 %v456_v57, %v308_v39 }
 0x1ca   :  { %691 = vmatpush.bf16.xpose.msra.mxu3 %v682_v60  ;;  %v652_v62 = vpack.c.bf16 %v492_v56, %v492_v56  ;;  %v2963_v63 = vpack.i.bf16 %v492_v56, %v490_v50 }
 0x1cb   :  { %v597_v14 = vpack.c.bf16 %v476_v3, %v476_v3  ;;  %v541_v28 = vpack.c.bf16 %v457_v11, %v457_v11 }
 0x1cc   :  { %v1109_v2 = vunpack.c.l.b16 %v652_v62 }
 0x1cd   :  { %2365 = vrot.lane.b32.xlu2 %v2349_v47, %s2821_s4  ;;  %v705_v20 = vunpack.c.l.b16 %v597_v14  ;;  %v700_v31 = vunpack.c.l.b16 %v541_v28 }
 0x1ce   :  { %v1110_v5 = vpack.c.b16 %v1109_v2, %v1108_v1 }
 0x1cf   :  { %v494_v6 = vpop.f32.mrf.mxu2 }
 0x1d0   :  { %1122 = vmatpush.bf16.msrb.mxu0 %v1110_v5  ;;  %v458_v8 = vpop.f32.mrf.mxu0  ;;  %v477_v9 = vpop.f32.mrf.mxu1  ;;  %v2970_v26 = vadd.f32 %v494_v6, %v310_v41 }
 0x1d1   :  { %v459_v12 = vadd.f32 %v458_v8, %v308_v39  ;;  %v478_v13 = vadd.f32 %v477_v9, %v309_v38  ;;  %2091 = vmatmul.msk.bf16.vlgmr.msra.gmra.mxu3 %vm677_vm13, %v671_v7 }
 0x1d3   :  { %v2359_v17 = vpack.i.bf16 %v478_v13, %v476_v3  ;;  %v2384_v18 = vpack.i.bf16 %v459_v12, %v457_v11  ;;  %v598_v19 = vpack.c.bf16 %v478_v13, %v478_v13  ;;  %v542_v16 = vpack.c.bf16 %v459_v12, %v459_v12 }
 0x1d5   :  { %2370 = vrot.lane.b32.xlu2 %v2354_v48, %s2821_s4  ;;  %2360 = vrot.lane.b32.xlu1 %v2359_v17, %s2820_s30  ;;  %v706_v21 = vunpack.c.l.b16 %v598_v19  ;;  %v701_v30 = vunpack.c.l.b16 %v542_v16 }
 0x1d6   :  { %2385 = vrot.lane.b32.xlu0 %v2384_v18, %s2820_s30 }
 0x1d7   :  { %v496_v22 = vpop.f32.mrf.mxu2  ;;  %v707_v25 = vpack.c.b16 %v706_v21, %v705_v20  ;;  %v702_v32 = vpack.c.b16 %v701_v30, %v700_v31 }
 0x1d8   :  { %v2972_v27 = vadd.f32 %v496_v22, %v310_v41 }
 0x1d9   :  { %v712_v24 = vsel %vm677_vm13, %v707_v25, 0 }
 0x1da   :  { %721 = vmatpush.bf16.xpose.msrb.mxu3 %v712_v24  ;;  %v2977_v29 = vpack.i.bf16 %v2972_v27, %v2970_v26 }
 0x1dd   :  { %2380 = vrot.lane.b32.xlu2 %v2354_v48, %s2815_s21  ;;  %2375 = vrot.lane.b32.xlu1 %v2349_v47, %s2815_s21 }
 0x1de   :  { %2390 = vrot.lane.b32.xlu0 %v2359_v17, %s2821_s4 }
 0x1e1   :  { %2092 = vmatmul.msk.bf16.vlgmr.msrb.gmra.mxu3 %vm677_vm13, %v702_v32 }
 0x1e5   :  { %2405 = vrot.lane.b32.xlu2 %v2384_v18, %s2815_s21  ;;  %2395 = vrot.lane.b32.xlu1 %v2384_v18, %s2821_s4 }
 0x1e6   :  { %2400 = vrot.lane.b32.xlu0 %v2359_v17, %s2815_s21 }
 0x21f   :  { %v2351_v33 = vpop.permute.xlu2 %2350 }
 0x220   :  { %v2353_v34 = vunpack.i.h.bf16 %v2351_v33  ;;  %v2352_v35 = vunpack.i.l.bf16 %v2351_v33 }
 0x222   :  { %v600_v36 = vpack.c.bf16 %v2353_v34, %v2353_v34  ;;  %v599_v37 = vpack.c.bf16 %v2352_v35, %v2352_v35 }
 0x224   :  { %v736_v38 = vunpack.c.l.b16 %v600_v36  ;;  %v735_v39 = vunpack.c.l.b16 %v599_v37 }
 0x226   :  { %v737_v40 = vpack.c.b16 %v736_v38, %v735_v39 }
 0x227   :  { %v2366_v23 = vpop.permute.xlu2 %2365 }
 0x228   :  { %v2368_v41 = vunpack.i.h.bf16 %v2366_v23  ;;  %v2367_v15 = vunpack.i.l.bf16 %v2366_v23  ;;  %v742_v42 = vsel %vm677_vm13, %v737_v40, 0 }
 0x229   :  { %751 = vmatpush.bf16.xpose.msra.mxu3 %v742_v42 }
 0x22a   :  { %v608_v43 = vpack.c.bf16 %v2368_v41, %v2368_v41  ;;  %v607_v44 = vpack.c.bf16 %v2367_v15, %v2367_v15 }
 0x22c   :  { %v856_v45 = vunpack.c.l.b16 %v608_v43  ;;  %v855_v46 = vunpack.c.l.b16 %v607_v44 }
 0x22e   :  { %v857_v47 = vpack.c.b16 %v856_v45, %v855_v46 }
 0x22f   :  { %v2371_v48 = vpop.permute.xlu2 %2370 }
 0x230   :  { %v2373_v49 = vunpack.i.h.bf16 %v2371_v48  ;;  %v2372_v50 = vunpack.i.l.bf16 %v2371_v48  ;;  %v862_v51 = vsel %vm677_vm13, %v857_v47, 0 }
 0x231   :  { %871 = vmatpush.bf16.xpose.msrb.mxu2 %v862_v51 }
 0x232   :  { %v552_v52 = vpack.c.bf16 %v2373_v49, %v2373_v49  ;;  %v551_v53 = vpack.c.bf16 %v2372_v50, %v2372_v50  ;;  %v654_v49 = vpack.c.bf16 %v2972_v27, %v2972_v27 }
 0x234   :  { %v851_v54 = vunpack.c.l.b16 %v552_v52  ;;  %v850_v55 = vunpack.c.l.b16 %v551_v53 }
 0x236   :  { %v852_v56 = vpack.c.b16 %v851_v54, %v850_v55 }
 0x237   :  { %v2356_v57 = vpop.permute.xlu0 %2355  ;;  %v2381_v13 = vpop.permute.xlu2 %2380 }
 0x238   :  { %v2358_v58 = vunpack.i.h.bf16 %v2356_v57  ;;  %v2357_v59 = vunpack.i.l.bf16 %v2356_v57  ;;  %2097 = vmatmul.msk.bf16.vlgmr.msrb.gmra.mxu2 %vm677_vm13, %v852_v56  ;;  %v2383_v25 = vunpack.i.h.bf16 %v2381_v13  ;;  %v2382_v28 = vunpack.i.l.bf16 %v2381_v13 }
 0x239   :  { %v653_v57 = vpack.c.bf16 %v2970_v26, %v2970_v26 }
 0x23a   :  { %v544_v60 = vpack.c.bf16 %v2358_v58, %v2358_v58  ;;  %v543_v61 = vpack.c.bf16 %v2357_v59, %v2357_v59  ;;  %v548_v15 = vpack.c.bf16 %v2383_v25, %v2383_v25  ;;  %v547_v42 = vpack.c.bf16 %v2382_v28, %v2382_v28 }
 0x23c   :  { %v731_v62 = vunpack.c.l.b16 %v544_v60  ;;  %v730_v0 = vunpack.c.l.b16 %v543_v61  ;;  %v791_v53 = vunpack.c.l.b16 %v548_v15  ;;  %v790_v54 = vunpack.c.l.b16 %v547_v42 }
 0x23d   :  { %v1137_v61 = vunpack.c.l.b16 %v654_v49 }
 0x23e   :  { %v732_v1 = vpack.c.b16 %v731_v62, %v730_v0 }
 0x240   :  { %2093 = vmatmul.msk.bf16.vlgmr.msra.gmra.mxu3 %vm677_vm13, %v732_v1  ;;  %v792_v1 = vpack.c.b16 %v791_v53, %v790_v54 }
 0x247   :  { %v2361_v2 = vpop.permute.xlu1 %2360 }
 0x248   :  { %v2363_v3 = vunpack.i.h.bf16 %v2361_v2  ;;  %v2362_v4 = vunpack.i.l.bf16 %v2361_v2  ;;  %v2386_v5 = vpop.permute.xlu0 %2385 }
 0x249   :  { %v2388_v8 = vunpack.i.h.bf16 %v2386_v5  ;;  %v2387_v9 = vunpack.i.l.bf16 %v2386_v5  ;;  %v2406_v5 = vpop.permute.xlu2 %2405 }
 0x24a   :  { %v602_v6 = vpack.c.bf16 %v2363_v3, %v2363_v3  ;;  %v601_v7 = vpack.c.bf16 %v2362_v4, %v2362_v4  ;;  %v1136_v4 = vunpack.c.l.b16 %v653_v57 }
 0x24b   :  { %v546_v17 = vpack.c.bf16 %v2388_v8, %v2388_v8  ;;  %v545_v18 = vpack.c.bf16 %v2387_v9, %v2387_v9  ;;  %v2408_v8 = vunpack.i.h.bf16 %v2406_v5  ;;  %v2407_v9 = vunpack.i.l.bf16 %v2406_v5 }
 0x24c   :  { %v766_v11 = vunpack.c.l.b16 %v602_v6  ;;  %v765_v12 = vunpack.c.l.b16 %v601_v7  ;;  %v1138_v7 = vpack.c.b16 %v1137_v61, %v1136_v4 }
 0x24d   :  { %v761_v31 = vunpack.c.l.b16 %v546_v17  ;;  %v760_v32 = vunpack.c.l.b16 %v545_v18  ;;  %v550_v17 = vpack.c.bf16 %v2408_v8, %v2408_v8  ;;  %v549_v18 = vpack.c.bf16 %v2407_v9, %v2407_v9 }
 0x24e   :  { %v767_v14 = vpack.c.b16 %v766_v11, %v765_v12 }
 0x24f   :  { %v2376_v19 = vpop.permute.xlu1 %2375  ;;  %v762_v43 = vpack.c.b16 %v761_v31, %v760_v32 }
 0x250   :  { %v2378_v20 = vunpack.i.h.bf16 %v2376_v19  ;;  %v2377_v21 = vunpack.i.l.bf16 %v2376_v19  ;;  %v2391_v16 = vpop.permute.xlu0 %2390  ;;  %v772_v22 = vsel %vm677_vm13, %v767_v14, 0 }
 0x251   :  { %v2393_v24 = vunpack.i.h.bf16 %v2391_v16  ;;  %v2392_v30 = vunpack.i.l.bf16 %v2391_v16  ;;  %781 = vmatpush.bf16.xpose.msrb.mxu3 %v772_v22 }
 0x252   :  { %v604_v33 = vpack.c.bf16 %v2378_v20, %v2378_v20  ;;  %v603_v34 = vpack.c.bf16 %v2377_v21, %v2377_v21  ;;  %v821_v20 = vunpack.c.l.b16 %v550_v17  ;;  %v820_v21 = vunpack.c.l.b16 %v549_v18 }
 0x253   :  { %v610_v35 = vpack.c.bf16 %v2393_v24, %v2393_v24  ;;  %v609_v36 = vpack.c.bf16 %v2392_v30, %v2392_v30 }
 0x254   :  { %v796_v37 = vunpack.c.l.b16 %v604_v33  ;;  %v795_v38 = vunpack.c.l.b16 %v603_v34  ;;  %v2991_v39 = vpop.f32.mrf.mxu3  ;;  %v822_v25 = vpack.c.b16 %v821_v20, %v820_v21 }
 0x255   :  { %v886_v40 = vunpack.c.l.b16 %v610_v35  ;;  %v885_v23 = vunpack.c.l.b16 %v609_v36  ;;  %v909_v41 = vsel %vm908_vm14, %v2991_v39, -inf }
 0x256   :  { %910 = vmax.xlane.f32.xlu2 %v909_v41  ;;  %v797_v44 = vpack.c.b16 %v796_v37, %v795_v38 }
 0x257   :  { %v887_v45 = vpack.c.b16 %v886_v40, %v885_v23  ;;  %v2396_v46 = vpop.permute.xlu1 %2395 }
 0x258   :  { %v2401_v47 = vpop.permute.xlu0 %2400  ;;  %2094 = vmatmul.msk.bf16.vlgmr.msrb.gmra.mxu3 %vm677_vm13, %v762_v43  ;;  %v802_v48 = vsel %vm677_vm13, %v797_v44, 0  ;;  %v2398_v55 = vunpack.i.h.bf16 %v2396_v46  ;;  %v2397_v56 = vunpack.i.l.bf16 %v2396_v46 }
 0x259   :  { %v2403_v50 = vunpack.i.h.bf16 %v2401_v47  ;;  %v2402_v51 = vunpack.i.l.bf16 %v2401_v47  ;;  %811 = vmatpush.bf16.xpose.msrb.mxu1 %v802_v48  ;;  %v892_v52 = vsel %vm677_vm13, %v887_v45, 0 }
 0x25a   :  { %901 = vmatpush.bf16.xpose.msra.mxu3 %v892_v52  ;;  %v554_v2 = vpack.c.bf16 %v2398_v55, %v2398_v55  ;;  %v553_v3 = vpack.c.bf16 %v2397_v56, %v2397_v56 }
 0x25b   :  { %v606_v58 = vpack.c.bf16 %v2403_v50, %v2403_v50  ;;  %v605_v59 = vpack.c.bf16 %v2402_v51, %v2402_v51 }
 0x25c   :  { %v3002_v60 = vpop.f32.mrf.mxu3  ;;  %v881_v11 = vunpack.c.l.b16 %v554_v2  ;;  %v880_v12 = vunpack.c.l.b16 %v553_v3 }
 0x25d   :  { %v826_v62 = vunpack.c.l.b16 %v606_v58  ;;  %v825_v27 = vunpack.c.l.b16 %v605_v59  ;;  %v912_v0 = vsel %vm908_vm14, %v3002_v60, -inf }
 0x25e   :  { %913 = vmax.xlane.f32.xlu1 %v912_v0  ;;  %v882_v19 = vpack.c.b16 %v881_v11, %v880_v12 }
 0x25f   :  { %v827_v6 = vpack.c.b16 %v826_v62, %v825_v27 }
 0x260   :  { %2095 = vmatmul.msk.bf16.vlgmr.msrb.gmra.mxu1 %vm677_vm13, %v792_v1 }
 0x261   :  { %v832_v26 = vsel %vm677_vm13, %v827_v6, 0 }
 0x262   :  { %841 = vmatpush.bf16.xpose.msra.mxu1 %v832_v26 }
 0x264   :  { %v723_v13 = vpop.f32.mrf.mxu3 }
 0x265   :  { %v915_v14 = vsel %vm908_vm14, %v723_v13, -inf }
 0x266   :  { %916 = vmax.xlane.f32.xlu2 %v915_v14 }
 0x268   :  { %2098 = vmatmul.msk.bf16.vlgmr.msra.gmra.mxu3 %vm677_vm13, %v882_v19 }
 0x26a   :  { %1150 = vmatpush.bf16.msrb.mxu1 %v1138_v7 }
 0x26c   :  { %v3010_v16 = vpop.f32.mrf.mxu3 }
 0x26d   :  { %v918_v22 = vsel %vm908_vm14, %v3010_v16, -inf }
 0x26e   :  { %919 = vmax.xlane.f32.xlu1 %v918_v22 }
 0x270   :  { %2096 = vmatmul.msk.bf16.vlgmr.msra.gmra.mxu1 %vm677_vm13, %v822_v25 }
 0x2bb   :  { %v3019_v30 = vpop.f32.mrf.mxu2 }
 0x2bc   :  { %v945_v34 = vsel %vm908_vm14, %v3019_v30, -inf }
 0x2c3   :  { %v3015_v28 = vpop.f32.mrf.mxu3  ;;  %v3042_v44 = vpop.f32.mrf.mxu2 }
 0x2c4   :  { %v921_v24 = vsel %vm908_vm14, %v3015_v28, -inf  ;;  %v948_v49 = vsel %vm908_vm14, %v3042_v44, -inf }
 0x2c5   :  { %922 = vmax.xlane.f32.xlu1 %v921_v24 }
 0x2c9   :  { %v911_v31 = vpop.xlane.xlu2 %910 }
 0x2ca   :  { %v957_v32 = vsub.f32 %v2991_v39, %v911_v31 }
 0x2cb   :  { %v3032_v40 = vpop.f32.mrf.mxu3 }
 0x2cc   :  { %v973_v33 = vmul.f32 1.442695, %v957_v32  ;;  %v924_v41 = vsel %vm908_vm14, %v3032_v40, -inf }
 0x2cd   :  { %946 = vmax.xlane.f32.xlu1 %v945_v34 }
 0x2ce   :  { %2485 = vpow2.f32 %v973_v33 }
 0x2d1   :  { %v914_v15 = vpop.xlane.xlu1 %913 }
 0x2d2   :  { %v958_v45 = vsub.f32 %v3002_v60, %v914_v15 }
 0x2d4   :  { %v3024_v35 = vpop.eup %2485  ;;  %v975_v50 = vmul.f32 1.442695, %v958_v45 }
 0x2d5   :  { %v1005_v36 = vsel %vm908_vm14, %v3024_v35, 0.0 }
 0x2d6   :  { %1006 = vadd.xlane.f32.xlu1 %v1005_v36  ;;  %2487 = vpow2.f32 %v975_v50 }
 0x2d9   :  { %v917_v42 = vpop.xlane.xlu2 %916 }
 0x2da   :  { %v959_v46 = vsub.f32 %v723_v13, %v917_v42 }
 0x2db   :  { %v3040_v43 = vpop.f32.mrf.mxu3 }
 0x2dc   :  { %v977_v51 = vmul.f32 1.442695, %v959_v46  ;;  %v927_v55 = vsel %vm908_vm14, %v3040_v43, -inf  ;;  %v3061_v57 = vpop.eup %2487 }
 0x2dd   :  { %v3028_v37 = vpop.f32.mrf.mxu1  ;;  %v1008_v60 = vsel %vm908_vm14, %v3061_v57, 0.0 }
 0x2de   :  { %v933_v38 = vsel %vm908_vm14, %v3028_v37, -inf  ;;  %2489 = vpow2.f32 %v977_v51 }
 0x2df   :  { %934 = vmax.xlane.f32.xlu0 %v933_v38 }
 0x2e1   :  { %v920_v27 = vpop.xlane.xlu1 %919 }
 0x2e2   :  { %v960_v0 = vsub.f32 %v3010_v16, %v920_v27 }
 0x2e3   :  { %v3051_v52 = vpop.f32.mrf.mxu3 }
 0x2e4   :  { %v930_v56 = vsel %vm908_vm14, %v3051_v52, -inf  ;;  %v3063_v58 = vpop.eup %2489  ;;  %v979_v1 = vmul.f32 1.442695, %v960_v0 }
 0x2e5   :  { %v3034_v39 = vpop.f32.mrf.mxu1  ;;  %v1011_v59 = vsel %vm908_vm14, %v3063_v58, 0.0 }
 0x2e6   :  { %v936_v23 = vsel %vm908_vm14, %v3034_v39, -inf  ;;  %2491 = vpow2.f32 %v979_v1 }
 0x2e7   :  { %937 = vmax.xlane.f32.xlu2 %v936_v23  ;;  %925 = vmax.xlane.f32.xlu0 %v924_v41 }
 0x2eb   :  { %v3069_v61 = vpop.f32.mrf.mxu3 }
 0x2ec   :  { %v951_v62 = vsel %vm908_vm14, %v3069_v61, -inf  ;;  %v3078_v3 = vpop.eup %2491 }
 0x2ed   :  { %v3045_v47 = vpop.f32.mrf.mxu1  ;;  %v1014_v5 = vsel %vm908_vm14, %v3078_v3, 0.0 }
 0x2ee   :  { %v939_v48 = vsel %vm908_vm14, %v3045_v47, -inf }
 0x2ef   :  { %940 = vmax.xlane.f32.xlu2 %v939_v48  ;;  %949 = vmax.xlane.f32.xlu0 %v948_v49 }
 0x2f3   :  { %v3083_v7 = vpop.f32.mrf.mxu3 }
 0x2f4   :  { %v954_v11 = vsel %vm908_vm14, %v3083_v7, -inf }
 0x2f5   :  { %v3053_v53 = vpop.f32.mrf.mxu1 }
 0x2f6   :  { %v942_v54 = vsel %vm908_vm14, %v3053_v53, -inf }
 0x2f7   :  { %943 = vmax.xlane.f32.xlu1 %v942_v54  ;;  %928 = vmax.xlane.f32.xlu0 %v927_v55 }
 0x2f8   :  { %931 = vmax.xlane.f32.xlu2 %v930_v56 }
 0x2ff   :  { %1012 = vadd.xlane.f32.xlu1 %v1011_v59  ;;  %1009 = vadd.xlane.f32.xlu0 %v1008_v60 }
 0x307   :  { %952 = vmax.xlane.f32.xlu1 %v951_v62 }
 0x310   :  { %2410 = vrot.lane.b32.xlu2 %v2963_v63, %s2820_s30 }
 0x313   :  { %2415 = vrot.lane.b32.xlu0 %v2977_v29, %s2820_s30 }
 0x338   :  { %v923_v2 = vpop.xlane.xlu1 %922 }
 0x339   :  { %v961_v4 = vsub.f32 %v3015_v28, %v923_v2 }
 0x33b   :  { %v981_v6 = vmul.f32 1.442695, %v961_v4 }
 0x33d   :  { %1015 = vadd.xlane.f32.xlu0 %v1014_v5  ;;  %2493 = vpow2.f32 %v981_v6 }
 0x340   :  { %v947_v26 = vpop.xlane.xlu1 %946 }
 0x341   :  { %v969_v8 = vsub.f32 %v3019_v30, %v947_v26 }
 0x343   :  { %v997_v9 = vmul.f32 1.442695, %v969_v8  ;;  %v3088_v12 = vpop.eup %2493 }
 0x344   :  { %v1017_v17 = vsel %vm908_vm14, %v3088_v12, 0.0 }
 0x345   :  { %2495 = vpow2.f32 %v997_v9  ;;  %955 = vmax.xlane.f32.xlu0 %v954_v11 }
 0x349   :  { %v1007_v32 = vpop.xlane.xlu1 %1006 }
 0x34b   :  { %v3090_v13 = vpop.eup %2495 }
 0x34c   :  { %v1041_v14 = vsel %vm908_vm14, %v3090_v13, 0.0 }
 0x34d   :  { %1042 = vadd.xlane.f32.xlu1 %v1041_v14  ;;  %1018 = vadd.xlane.f32.xlu0 %v1017_v17 }
 0x352   :  { %v935_v18 = vpop.xlane.xlu0 %934 }
 0x353   :  { %v965_v19 = vsub.f32 %v3028_v37, %v935_v18 }
 0x355   :  { %v989_v20 = vmul.f32 1.442695, %v965_v19 }
 0x357   :  { %2497 = vpow2.f32 %v989_v20 }
 0x35a   :  { %v938_v21 = vpop.xlane.xlu2 %937  ;;  %v926_v16 = vpop.xlane.xlu0 %925 }
 0x35b   :  { %v966_v22 = vsub.f32 %v3034_v39, %v938_v21  ;;  %v962_v25 = vsub.f32 %v3032_v40, %v926_v16 }
 0x35d   :  { %v3099_v28 = vpop.eup %2497  ;;  %v991_v24 = vmul.f32 1.442695, %v966_v22  ;;  %v983_v30 = vmul.f32 1.442695, %v962_v25 }
 0x35e   :  { %v1029_v31 = vsel %vm908_vm14, %v3099_v28, 0.0 }
 0x35f   :  { %2499 = vpow2.f32 %v991_v24  ;;  %1030 = vadd.xlane.f32.xlu2 %v1029_v31 }
 0x360   :  { %2501 = vpow2.f32 %v983_v30 }
 0x362   :  { %v941_v33 = vpop.xlane.xlu2 %940  ;;  %v950_v34 = vpop.xlane.xlu0 %949 }
 0x363   :  { %v967_v36 = vsub.f32 %v3045_v47, %v941_v33  ;;  %v970_v37 = vsub.f32 %v3042_v44, %v950_v34 }
 0x365   :  { %v3105_v38 = vpop.eup %2499  ;;  %v993_v40 = vmul.f32 1.442695, %v967_v36  ;;  %v999_v39 = vmul.f32 1.442695, %v970_v37 }
 0x366   :  { %v3107_v23 = vpop.eup %2501  ;;  %v1032_v41 = vsel %vm908_vm14, %v3105_v38, 0.0 }
 0x367   :  { %2503 = vpow2.f32 %v993_v40  ;;  %v1020_v15 = vsel %vm908_vm14, %v3107_v23, 0.0  ;;  %1033 = vadd.xlane.f32.xlu1 %v1032_v41 }
 0x368   :  { %2505 = vpow2.f32 %v999_v39  ;;  %1021 = vadd.xlane.f32.xlu2 %v1020_v15 }
 0x369   :  { %2507 = vrcp.f32 %v1007_v32 }
 0x36a   :  { %v944_v42 = vpop.xlane.xlu1 %943  ;;  %v929_v45 = vpop.xlane.xlu0 %928 }
 0x36b   :  { %v968_v44 = vsub.f32 %v3053_v53, %v944_v42  ;;  %v963_v46 = vsub.f32 %v3040_v43, %v929_v45  ;;  %v932_v47 = vpop.xlane.xlu2 %931 }
 0x36c   :  { %v964_v32 = vsub.f32 %v3051_v52, %v932_v47 }
 0x36d   :  { %v3115_v48 = vpop.eup %2503  ;;  %v995_v49 = vmul.f32 1.442695, %v968_v44  ;;  %v985_v50 = vmul.f32 1.442695, %v963_v46 }
 0x36e   :  { %v3117_v51 = vpop.eup %2505  ;;  %v1035_v54 = vsel %vm908_vm14, %v3115_v48, 0.0  ;;  %v987_v33 = vmul.f32 1.442695, %v964_v32 }
 0x36f   :  { %2509 = vpow2.f32 %v995_v49  ;;  %v1044_v55 = vsel %vm908_vm14, %v3117_v51, 0.0  ;;  %v2508_v56 = vpop.eup %2507 }
 0x370   :  { %2511 = vpow2.f32 %v985_v50  ;;  %1036 = vadd.xlane.f32.xlu2 %v1035_v54  ;;  %1045 = vadd.xlane.f32.xlu0 %v1044_v55  ;;  %v1069_v4 = vmul.f32 %v2508_v56, %v3024_v35 }
 0x372   :  { %v1010_v53 = vpop.xlane.xlu0 %1009  ;;  %v1085_v11 = vpack.c.bf16 %v1069_v4, %v1069_v4 }
 0x373   :  { %v2411_v43 = vpop.permute.xlu2 %2410  ;;  %2513 = vrcp.f32 %v1010_v53 }
 0x374   :  { %v2413_v59 = vunpack.i.h.bf16 %v2411_v43  ;;  %v2412_v60 = vunpack.i.l.bf16 %v2411_v43  ;;  %v1103_v18 = vunpack.c.l.b16 %v1085_v11  ;;  %2515 = vpow2.f32 %v987_v33 }
 0x375   :  { %v3123_v62 = vpop.eup %2509 }
 0x376   :  { %v3125_v27 = vpop.eup %2511  ;;  %v656_v0 = vpack.c.bf16 %v2413_v59, %v2413_v59  ;;  %v655_v1 = vpack.c.bf16 %v2412_v60, %v2412_v60  ;;  %v1038_v2 = vsel %vm908_vm14, %v3123_v62, 0.0 }
 0x377   :  { %v1023_v5 = vsel %vm908_vm14, %v3125_v27, 0.0 }
 0x378   :  { %v1165_v6 = vunpack.c.l.b16 %v656_v0  ;;  %v1164_v26 = vunpack.c.l.b16 %v655_v1  ;;  %1039 = vadd.xlane.f32.xlu2 %v1038_v2  ;;  %1024 = vadd.xlane.f32.xlu1 %v1023_v5 }
 0x379   :  { %v2514_v8 = vpop.eup %2513 }
 0x37a   :  { %v1166_v9 = vpack.c.b16 %v1165_v6, %v1164_v26  ;;  %v1070_v14 = vmul.f32 %v2514_v8, %v3061_v57  ;;  %v1013_v57 = vpop.xlane.xlu1 %1012  ;;  %v3142_v40 = vpop.eup %2515 }
 0x37b   :  { %2517 = vrcp.f32 %v1013_v57  ;;  %v1026_v39 = vsel %vm908_vm14, %v3142_v40, 0.0 }
 0x37c   :  { %1178 = vmatpush.bf16.msra.mxu2 %v1166_v9  ;;  %v1086_v17 = vpack.c.bf16 %v1070_v14, %v1070_v14 }
 0x37e   :  { %v1104_v19 = vunpack.c.l.b16 %v1086_v17 }
 0x380   :  { %v1105_v20 = vpack.c.b16 %v1104_v19, %v1103_v18 }
 0x381   :  { %v2518_v15 = vpop.eup %2517 }
 0x382   :  { %2099 = vmatmul.msk.bf16.vlgmr.msrb.gmra.mxu0 %vm908_vm14, %v1105_v20  ;;  %v953_v34 = vpop.xlane.xlu1 %952  ;;  %v1071_v52 = vmul.f32 %v2518_v15, %v3063_v58 }
 0x383   :  { %v971_v36 = vsub.f32 %v3069_v61, %v953_v34 }
 0x384   :  { %2425 = vrot.lane.b32.xlu0 %v2963_v63, %s2815_s21  ;;  %v1087_v45 = vpack.c.bf16 %v1071_v52, %v1071_v52 }
 0x385   :  { %v2416_v35 = vpop.permute.xlu0 %2415  ;;  %v1001_v37 = vmul.f32 1.442695, %v971_v36 }
 0x386   :  { %v2418_v21 = vunpack.i.h.bf16 %v2416_v35  ;;  %v2417_v16 = vunpack.i.l.bf16 %v2416_v35  ;;  %v1131_v54 = vunpack.c.l.b16 %v1087_v45 }
 0x387   :  { %2519 = vpow2.f32 %v1001_v37 }
 0x388   :  { %v658_v22 = vpack.c.bf16 %v2418_v21, %v2418_v21  ;;  %v657_v25 = vpack.c.bf16 %v2417_v16, %v2417_v16 }
 0x38a   :  { %v1193_v24 = vunpack.c.l.b16 %v658_v22  ;;  %v1192_v30 = vunpack.c.l.b16 %v657_v25 }
 0x38c   :  { %v1194_v31 = vpack.c.b16 %v1193_v24, %v1192_v30 }
 0x38e   :  { %1206 = vmatpush.bf16.msrb.mxu3 %v1194_v31 }
 0x390   :  { %2430 = vrot.lane.b32.xlu2 %v2977_v29, %s2821_s4 }
 0x391   :  { %2420 = vrot.lane.b32.xlu1 %v2963_v63, %s2821_s4  ;;  %v3146_v63 = vpop.eup %2519 }
 0x392   :  { %v1047_v42 = vsel %vm908_vm14, %v3146_v63, 0.0 }
 0x3ae   :  { %1027 = vadd.xlane.f32.xlu0 %v1026_v39 }
 0x3b0   :  { %v1016_v41 = vpop.xlane.xlu0 %1015 }
 0x3b1   :  { %2521 = vrcp.f32 %v1016_v41 }
 0x3b6   :  { %1048 = vadd.xlane.f32.xlu0 %v1047_v42 }
 0x3b7   :  { %v2522_v61 = vpop.eup %2521 }
 0x3b8   :  { %v1072_v44 = vmul.f32 %v2522_v61, %v3078_v3  ;;  %v956_v46 = vpop.xlane.xlu0 %955 }
 0x3b9   :  { %v972_v47 = vsub.f32 %v3083_v7, %v956_v46 }
 0x3ba   :  { %v1088_v49 = vpack.c.bf16 %v1072_v44, %v1072_v44 }
 0x3bb   :  { %v1003_v50 = vmul.f32 1.442695, %v972_v47 }
 0x3bc   :  { %v1132_v55 = vunpack.c.l.b16 %v1088_v49 }
 0x3bd   :  { %2523 = vpow2.f32 %v1003_v50 }
 0x3be   :  { %v1133_v53 = vpack.c.b16 %v1132_v55, %v1131_v54 }
 0x3c0   :  { %2100 = vmatmul.msk.bf16.vlgmr.msrb.gmra.mxu1 %vm908_vm14, %v1133_v53  ;;  %v1019_v56 = vpop.xlane.xlu0 %1018  ;;  %v1043_v0 = vpop.xlane.xlu1 %1042 }
 0x3c1   :  { %2525 = vrcp.f32 %v1019_v56 }
 0x3c3   :  { %v3154_v58 = vpop.eup %2523 }
 0x3c4   :  { %v1050_v43 = vsel %vm908_vm14, %v3154_v58, 0.0 }
 0x3c5   :  { %1051 = vadd.xlane.f32.xlu1 %v1050_v43 }
 0x3c7   :  { %v2526_v59 = vpop.eup %2525 }
 0x3c8   :  { %v1073_v60 = vmul.f32 %v2526_v59, %v3088_v12 }
 0x3ca   :  { %2435 = vrot.lane.b32.xlu0 %v2977_v29, %s2815_s21  ;;  %v1089_v2 = vpack.c.bf16 %v1073_v60, %v1073_v60 }
 0x3cc   :  { %v1159_v26 = vunpack.c.l.b16 %v1089_v2 }
 0x3d2   :  { %v1031_v3 = vpop.xlane.xlu2 %1030 }
 0x3da   :  { %v1034_v9 = vpop.xlane.xlu1 %1033 }
 0x3db   :  { %v1022_v7 = vpop.xlane.xlu2 %1021 }
 0x3dc   :  { %2527 = vrcp.f32 %v1022_v7 }
 0x3e2   :  { %v2528_v1 = vpop.eup %2527 }
 0x3e3   :  { %v1074_v4 = vmul.f32 %v2528_v1, %v3107_v23  ;;  %v1037_v5 = vpop.xlane.xlu2 %1036  ;;  %v1046_v12 = vpop.xlane.xlu0 %1045 }
 0x3e4   :  { %2529 = vrcp.f32 %v1037_v5 }
 0x3e5   :  { %v1090_v6 = vpack.c.bf16 %v1074_v4, %v1074_v4  ;;  %2531 = vrcp.f32 %v1034_v9 }
 0x3e7   :  { %v1160_v8 = vunpack.c.l.b16 %v1090_v6 }
 0x3e9   :  { %v1161_v29 = vpack.c.b16 %v1160_v8, %v1159_v26 }
 0x3ea   :  { %v2530_v14 = vpop.eup %2529 }
 0x3eb   :  { %v1040_v11 = vpop.xlane.xlu2 %1039  ;;  %2101 = vmatmul.msk.bf16.vlgmr.msra.gmra.mxu2 %vm908_vm14, %v1161_v29  ;;  %v1079_v17 = vmul.f32 %v2530_v14, %v3115_v48  ;;  %v2532_v18 = vpop.eup %2531 }
 0x3ec   :  { %2533 = vrcp.f32 %v1040_v11  ;;  %v1078_v16 = vmul.f32 %v2532_v18, %v3105_v38  ;;  %v1025_v42 = vpop.xlane.xlu1 %1024 }
 0x3ed   :  { %2535 = vrcp.f32 %v1031_v3  ;;  %v1095_v20 = vpack.c.bf16 %v1079_v17, %v1079_v17 }
 0x3ee   :  { %v1094_v37 = vpack.c.bf16 %v1078_v16, %v1078_v16  ;;  %2537 = vrcp.f32 %v1046_v12 }
 0x3ef   :  { %v3167_v33 = vunpack.c.l.b16 %v1095_v20  ;;  %2539 = vrcp.f32 %v1043_v0 }
 0x3f0   :  { %v1216_v44 = vunpack.c.l.b16 %v1094_v37  ;;  %2541 = vrcp.f32 %v1025_v42 }
 0x3f2   :  { %v2534_v19 = vpop.eup %2533 }
 0x3f3   :  { %v2536_v23 = vpop.eup %2535  ;;  %v1080_v35 = vmul.f32 %v2534_v19, %v3123_v62  ;;  %v2431_v21 = vpop.permute.xlu2 %2430 }
 0x3f4   :  { %v2433_v22 = vunpack.i.h.bf16 %v2431_v21  ;;  %v2432_v25 = vunpack.i.l.bf16 %v2431_v21  ;;  %v1077_v30 = vmul.f32 %v2536_v23, %v3099_v28  ;;  %v2538_v47 = vpop.eup %2537 }
 0x3f5   :  { %v1096_v24 = vpack.c.bf16 %v1080_v35, %v1080_v35  ;;  %v2540_v50 = vpop.eup %2539  ;;  %v1082_v55 = vmul.f32 %v2538_v47, %v3117_v51 }
 0x3f6   :  { %v666_v31 = vpack.c.bf16 %v2433_v22, %v2433_v22  ;;  %v665_v57 = vpack.c.bf16 %v2432_v25, %v2432_v25  ;;  %v2426_v32 = vpop.permute.xlu0 %2425  ;;  %v1093_v28 = vpack.c.bf16 %v1077_v30, %v1077_v30  ;;  %v1081_v53 = vmul.f32 %v2540_v50, %v3090_v13  ;;  %v2542_v8 = vpop.eup %2541 }
 0x3f7   :  { %v3169_v48 = vunpack.c.l.b16 %v1096_v24  ;;  %v2428_v34 = vunpack.i.h.bf16 %v2426_v32  ;;  %v2427_v36 = vunpack.i.l.bf16 %v2426_v32  ;;  %v1098_v7 = vpack.c.bf16 %v1082_v55, %v1082_v55  ;;  %v2296_v55 = vld [vmem:[#allocation10 + $0x28] sm:$0xff] }
 0x3f8   :  { %v1305_v62 = vunpack.c.l.b16 %v666_v31  ;;  %v1304_v39 = vunpack.c.l.b16 %v665_v57  ;;  %v1215_v49 = vunpack.c.l.b16 %v1093_v28  ;;  %v1097_v0 = vpack.c.bf16 %v1081_v53, %v1081_v53  ;;  %v2295_v53 = vld [vmem:[#allocation10 + $0x20] sm:$0xff] }
 0x3f9   :  { %v1245_v38 = vpack.c.b16 %v3169_v48, %v3167_v33  ;;  %v660_v41 = vpack.c.bf16 %v2428_v34, %v2428_v34  ;;  %v659_v15 = vpack.c.bf16 %v2427_v36, %v2427_v36  ;;  %v1272_v4 = vunpack.c.l.b16 %v1098_v7 }
 0x3fa   :  { %v1306_v52 = vpack.c.b16 %v1305_v62, %v1304_v39  ;;  %v1217_v54 = vpack.c.b16 %v1216_v44, %v1215_v49  ;;  %v1271_v6 = vunpack.c.l.b16 %v1097_v0  ;;  %v1075_v13 = vmul.f32 %v2542_v8, %v3125_v27  ;;  %v2292_v0 = vld [vmem:[#allocation10 + $0x8] sm:$0xff] }
 0x3fb   :  { %v1221_v61 = vunpack.c.l.b16 %v660_v41  ;;  %v1220_v45 = vunpack.c.l.b16 %v659_v15 }
 0x3fc   :  { %1318 = vmatpush.bf16.msra.mxu3 %v1306_v52  ;;  %v1273_v26 = vpack.c.b16 %v1272_v4, %v1271_v6  ;;  %v1091_v29 = vpack.c.bf16 %v1075_v13, %v1075_v13 }
 0x3fd   :  { %v1222_v46 = vpack.c.b16 %v1221_v61, %v1220_v45 }
 0x3fe   :  { %v1187_v12 = vunpack.c.l.b16 %v1091_v29 }
 0x3ff   :  { %1234 = vmatpush.bf16.msra.mxu0 %v1222_v46  ;;  %v2297_v46 = vld [vmem:[#allocation10 + $0x30] sm:$0xff] }
 0x402   :  { %2103 = vmatmul.msk.bf16.vlgmr.msra.gmra.mxu0 %vm908_vm14, %v1217_v54 }
 0x403   :  { %v2421_v43 = vpop.permute.xlu1 %2420 }
 0x404   :  { %v2423_v3 = vunpack.i.h.bf16 %v2421_v43  ;;  %v2422_v56 = vunpack.i.l.bf16 %v2421_v43 }
 0x406   :  { %v664_v59 = vpack.c.bf16 %v2423_v3, %v2423_v3  ;;  %v663_v60 = vpack.c.bf16 %v2422_v56, %v2422_v56  ;;  %v2294_v56 = vld [vmem:[#allocation10 + $0x18] sm:$0xff] }
 0x408   :  { %v1277_v1 = vunpack.c.l.b16 %v664_v59  ;;  %v1276_v2 = vunpack.c.l.b16 %v663_v60  ;;  %v2293_v59 = vld [vmem:[#allocation10 + $0x10] sm:$0xff] }
 0x40a   :  { %v1278_v5 = vpack.c.b16 %v1277_v1, %v1276_v2  ;;  %v2291_v2 = vld [vmem:[#allocation10] sm:$0xff] }
 0x40c   :  { %1290 = vmatpush.bf16.msrb.mxu2 %v1278_v5 }
 0x40f   :  { %2105 = vmatmul.msk.bf16.vlgmr.msrb.gmra.mxu2 %vm908_vm14, %v1273_v26 }
 0x421   :  { %v1028_v51 = vpop.xlane.xlu0 %1027 }
 0x422   :  { %2543 = vrcp.f32 %v1028_v51 }
 0x428   :  { %v2544_v9 = vpop.eup %2543 }
 0x429   :  { %v1076_v11 = vmul.f32 %v2544_v9, %v3142_v40  ;;  %v1049_v19 = vpop.xlane.xlu0 %1048 }
 0x42a   :  { %2545 = vrcp.f32 %v1049_v19 }
 0x42b   :  { %v1092_v14 = vpack.c.bf16 %v1076_v11, %v1076_v11 }
 0x42d   :  { %v1188_v17 = vunpack.c.l.b16 %v1092_v14 }
 0x42f   :  { %v1189_v18 = vpack.c.b16 %v1188_v17, %v1187_v12 }
 0x430   :  { %v2546_v20 = vpop.eup %2545 }
 0x431   :  { %2102 = vmatmul.msk.bf16.vlgmr.msrb.gmra.mxu3 %vm908_vm14, %v1189_v18  ;;  %v1083_v35 = vmul.f32 %v2546_v20, %v3146_v63  ;;  %v1124_v63 = vpop.f32.mrf.mxu0 }
 0x433   :  { %v1099_v40 = vpack.c.bf16 %v1083_v35, %v1083_v35 }
 0x435   :  { %v1299_v36 = vunpack.c.l.b16 %v1099_v40 }
 0x438   :  { %v1052_v23 = vpop.xlane.xlu1 %1051 }
 0x439   :  { %2547 = vrcp.f32 %v1052_v23  ;;  %v1126_v15 = vpop.f32.mrf.mxu0 }
 0x43c   :  { %v2436_v21 = vpop.permute.xlu0 %2435 }
 0x43d   :  { %v2438_v16 = vunpack.i.h.bf16 %v2436_v21  ;;  %v2437_v27 = vunpack.i.l.bf16 %v2436_v21  ;;  %v1152_v33 = vpop.f32.mrf.mxu1 }
 0x43f   :  { %v2548_v22 = vpop.eup %2547  ;;  %v662_v25 = vpack.c.bf16 %v2438_v16, %v2438_v16  ;;  %v661_v24 = vpack.c.bf16 %v2437_v27, %v2437_v27 }
 0x440   :  { %v1084_v30 = vmul.f32 %v2548_v22, %v3154_v58 }
 0x441   :  { %v1249_v31 = vunpack.c.l.b16 %v662_v25  ;;  %v1248_v57 = vunpack.c.l.b16 %v661_v24 }
 0x442   :  { %v1100_v32 = vpack.c.bf16 %v1084_v30, %v1084_v30 }
 0x443   :  { %v1250_v34 = vpack.c.b16 %v1249_v31, %v1248_v57 }
 0x444   :  { %v1300_v37 = vunpack.c.l.b16 %v1100_v32 }
 0x445   :  { %1262 = vmatpush.bf16.msra.mxu1 %v1250_v34  ;;  %v1154_v49 = vpop.f32.mrf.mxu1 }
 0x446   :  { %v1301_v62 = vpack.c.b16 %v1300_v37, %v1299_v36 }
 0x448   :  { %2104 = vmatmul.msk.bf16.vlgmr.msra.gmra.mxu1 %vm908_vm14, %v1245_v38  ;;  %2106 = vmatmul.msk.bf16.vlgmr.msra.gmra.mxu3 %vm908_vm14, %v1301_v62  ;;  %v2298_v38 = vld [vmem:[#allocation10 + $0x38] sm:$0xff]  ;;  %v2471_v62 = vld [vmem:[#allocation11] ss:$0 sm:$0xff] }
 0x449   :  { %1457 = vmatpush.bf16.msrb.mxu0 %v2298_v38 }
 0x44d   :  { %1458 = vmatpush.bf16.msrb.mxu0 %v2297_v46  ;;  %v2576_v46 = vld [vmem:[#allocation2 + $0x18] sm:$0xff] }
 0x451   :  { %1459 = vmatpush.bf16.msrb.mxu0 %v2296_v55 }
 0x455   :  { %1460 = vmatpush.bf16.msrb.mxu0 %v2295_v53 }
 0x459   :  { %1461 = vmatpush.bf16.msrb.mxu0 %v2294_v56 }
 0x45d   :  { %1462 = vmatpush.bf16.msrb.mxu0 %v2293_v59 }
 0x461   :  { %1463 = vmatpush.bf16.msrb.mxu0 %v2292_v0 }
 0x465   :  { %1464 = vmatpush.bf16.msrb.mxu0 %v2291_v2 }
 0x46e   :  { %v1180_v39 = vpop.f32.mrf.mxu2 }
 0x476   :  { %v1182_v41 = vpop.f32.mrf.mxu2 }
 0x477   :  { %v2439_v58 = vpack.i.bf16 %v1182_v41, %v1180_v39  ;;  %v2573_v41 = vld [vmem:[#allocation2] sm:$0xff] }
 0x479   :  { %2440 = vrot.lane.b32.xlu1 %v2439_v58, %s2821_s4 }
 0x47f   :  { %v1236_v28 = vpop.f32.mrf.mxu0 }
 0x487   :  { %v1238_v52 = vpop.f32.mrf.mxu0 }
 0x488   :  { %v2444_v42 = vpack.i.bf16 %v1238_v52, %v1236_v28  ;;  %v2574_v52 = vld [vmem:[#allocation2 + $0x8] sm:$0xff] }
 0x48a   :  { %2445 = vrot.lane.b32.xlu2 %v2444_v42, %s2815_s21 }
 0x492   :  { %v1292_v61 = vpop.f32.mrf.mxu2 }
 0x49a   :  { %v1294_v45 = vpop.f32.mrf.mxu2 }
 0x49b   :  { %v2449_v44 = vpack.i.bf16 %v1294_v45, %v1292_v61 }
 0x49d   :  { %2450 = vrot.lane.b32.xlu2 %v2449_v44, %s2820_s30  ;;  %v2575_v44 = vld [vmem:[#allocation2 + $0x10] sm:$0xff] }
 0x4b4   :  { %v1208_v48 = vpop.f32.mrf.mxu3 }
 0x4bc   :  { %v1210_v47 = vpop.f32.mrf.mxu3 }
 0x4bd   :  { %v2454_v50 = vpack.i.bf16 %v1210_v47, %v1208_v48 }
 0x4bf   :  { %2455 = vrot.lane.b32.xlu0 %v2454_v50, %s2821_s4 }
 0x4c5   :  { %v1264_v54 = vpop.f32.mrf.mxu1 }
 0x4cb   :  { %v1320_v43 = vpop.f32.mrf.mxu3 }
 0x4cd   :  { %v1266_v3 = vpop.f32.mrf.mxu1 }
 0x4ce   :  { %v2459_v7 = vpack.i.bf16 %v1266_v3, %v1264_v54 }
 0x4d0   :  { %2460 = vrot.lane.b32.xlu2 %v2459_v7, %s2815_s21  ;;  %s1978_s21 = sshll.u32 %s3296_s13, 4  ;;  %s1979_s21 = int_to_ptr.hbm [resolvable:$true] %s1978_s21 }
 0x4d3   :  { %v1322_v60 = vpop.f32.mrf.mxu3 }
 0x4d4   :  { %v2464_v1 = vpack.i.bf16 %v1322_v60, %v1320_v43 }
 0x4d6   :  { %2465 = vrot.lane.b32.xlu1 %v2464_v1, %s2820_s30 }
 0x4e4   :  { %v2446_v4 = vpop.permute.xlu2 %2445 }
 0x4e5   :  { %v2448_v13 = vunpack.i.h.bf16 %v2446_v4  ;;  %v2447_v9 = vunpack.i.l.bf16 %v2446_v4 }
 0x4eb   :  { %v2441_v5 = vpop.permute.xlu1 %2440 }
 0x4ec   :  { %v2443_v6 = vunpack.i.h.bf16 %v2441_v5  ;;  %v2442_v26 = vunpack.i.l.bf16 %v2441_v5 }
 0x4ee   :  { %v1374_v51 = vsel %vm677_vm13, %v1126_v15, %v2443_v6  ;;  %v1373_v8 = vsel %vm677_vm13, %v1124_v63, %v2442_v26  ;;  %v2197_v6 = vld [vmem:[#allocation13 + $0x70] sm:$0xf]  ;;  %v2314_v26 = vld [vmem:[#allocation13 + $0x74] sm:$0xf0] }
 0x4ef   :  { %v1378_v12 = vsel %vm1377_vm15, %v1373_v8, %v2447_v9  ;;  %v1379_v17 = vsel %vm1377_vm15, %v1374_v51, %v2448_v13  ;;  %v2313_v51 = vld [vmem:[#allocation13 + $0x74] sm:$0xf]  ;;  %v2198_v8 = vor.u32 %v2314_v26, %v2197_v6  ;;  %v2199_v13 = vld [vmem:[#allocation13 + $0x78] sm:$0xf0] }
 0x4f0   :  { %v2202_v9 = vor.u32 %v2313_v51, %v2199_v13 }
 0x4f1   :  { %1680 = vmatpush.bf16.msrb.mxu1 %v2198_v8 }
 0x4f2   :  { %1699 = vmatpush.bf16.msra.mxu2 %v2202_v9 }
 0x4f7   :  { %v2451_v29 = vpop.permute.xlu2 %2450 }
 0x4f8   :  { %v2453_v11 = vunpack.i.h.bf16 %v2451_v29  ;;  %v2452_v14 = vunpack.i.l.bf16 %v2451_v29  ;;  %v2189_v29 = vld [vmem:[#allocation13 + $0x60] sm:$0xf] }
 0x4fa   :  { %v1383_v18 = vsel %vm1382_vm0, %v1378_v12, %v2452_v14  ;;  %v1384_v19 = vsel %vm1382_vm0, %v1379_v17, %v2453_v11  ;;  %v2312_v11 = vld [vmem:[#allocation13 + $0x64] sm:$0xf0]  ;;  %v2311_v14 = vld [vmem:[#allocation13 + $0x64] sm:$0xf]  ;;  %v2191_v17 = vld [vmem:[#allocation13 + $0x68] sm:$0xf0] }
 0x4fb   :  { %v1387_v23 = vpack.c.bf16 %v1384_v19, %v1383_v18  ;;  %v2190_v12 = vor.u32 %v2312_v11, %v2189_v29  ;;  %v2194_v18 = vor.u32 %v2311_v14, %v2191_v17  ;;  %v2181_v19 = vld [vmem:[#allocation13 + $0x50] sm:$0xf] }
 0x4fd   :  { %1465 = vmatmul.bf16.vlgmr.msrb.gmra.mxu0 %v1387_v23  ;;  %1681 = vmatpush.bf16.msrb.mxu1 %v2190_v12  ;;  %v2310_v23 = vld [vmem:[#allocation13 + $0x54] sm:$0xf0] }
 0x4fe   :  { %1700 = vmatpush.bf16.msra.mxu2 %v2194_v18 }
 0x52a   :  { %v2461_v16 = vpop.permute.xlu2 %2460 }
 0x52b   :  { %v2463_v25 = vunpack.i.h.bf16 %v2461_v16  ;;  %v2462_v24 = vunpack.i.l.bf16 %v2461_v16 }
 0x531   :  { %v2456_v20 = vpop.permute.xlu0 %2455 }
 0x532   :  { %v2458_v35 = vunpack.i.h.bf16 %v2456_v20  ;;  %v2457_v21 = vunpack.i.l.bf16 %v2456_v20  ;;  %v2309_v20 = vld [vmem:[#allocation13 + $0x54] sm:$0xf] }
 0x534   :  { %v1376_v27 = vsel %vm677_vm13, %v1154_v49, %v2458_v35  ;;  %v1375_v22 = vsel %vm677_vm13, %v1152_v33, %v2457_v21  ;;  %v2182_v35 = vor.u32 %v2310_v23, %v2181_v19  ;;  %v2183_v21 = vld [vmem:[#allocation13 + $0x58] sm:$0xf0]  ;;  %v2472_v19 = vld [vmem:[%s3290_s7] ss:$0 sm:$0xff] }
 0x535   :  { %v1380_v57 = vsel %vm1377_vm15, %v1375_v22, %v2462_v24  ;;  %v1381_v32 = vsel %vm1377_vm15, %v1376_v27, %v2463_v25  ;;  %v2186_v16 = vor.u32 %v2309_v20, %v2183_v21  ;;  %v2173_v27 = vld [vmem:[#allocation13 + $0x40] sm:$0xf]  ;;  %v2308_v22 = vld [vmem:[#allocation13 + $0x44] sm:$0xf0]  ;;  %v2307_v25 = vld [vmem:[#allocation13 + $0x44] sm:$0xf] }
 0x536   :  { %1682 = vmatpush.bf16.msrb.mxu1 %v2182_v35  ;;  %v2174_v24 = vor.u32 %v2308_v22, %v2173_v27 }
 0x537   :  { %1701 = vmatpush.bf16.msra.mxu2 %v2186_v16  ;;  %v2473_v16 = vld [vmem:[%s3291_s8] ss:$0 sm:$0xff] }
 0x53a   :  { %1683 = vmatpush.bf16.msrb.mxu1 %v2174_v24 }
 0x548   :  { %v2466_v40 = vpop.permute.xlu1 %2465 }
 0x549   :  { %v2468_v30 = vunpack.i.h.bf16 %v2466_v40  ;;  %v2467_v31 = vunpack.i.l.bf16 %v2466_v40  ;;  %v2175_v40 = vld [vmem:[#allocation13 + $0x48] sm:$0xf0] }
 0x54b   :  { %v1385_v34 = vsel %vm1382_vm0, %v1380_v57, %v2467_v31  ;;  %v1386_v36 = vsel %vm1382_vm0, %v1381_v32, %v2468_v30  ;;  %v2178_v30 = vor.u32 %v2307_v25, %v2175_v40  ;;  %v2165_v31 = vld [vmem:[#allocation13 + $0x30] sm:$0xf]  ;;  %v2306_v57 = vld [vmem:[#allocation13 + $0x34] sm:$0xf0]  ;;  %v2305_v32 = vld [vmem:[#allocation13 + $0x34] sm:$0xf] }
 0x54c   :  { %v1388_v37 = vpack.c.bf16 %v1386_v36, %v1385_v34  ;;  %v2166_v34 = vor.u32 %v2306_v57, %v2165_v31  ;;  %v2167_v36 = vld [vmem:[#allocation13 + $0x38] sm:$0xf0] }
 0x54d   :  { %1702 = vmatpush.bf16.msra.mxu2 %v2178_v30 }
 0x54e   :  { %1470 = vmatmul.bf16.gmra.mxu0 %v1388_v37  ;;  %v2170_v37 = vor.u32 %v2305_v32, %v2167_v36  ;;  %1684 = vmatpush.bf16.msrb.mxu1 %v2166_v34 }
 0x551   :  { %1703 = vmatpush.bf16.msra.mxu2 %v2170_v37 }
 0x57a   :  { %v1466_v63 = vpop.f32.mrf.mxu0 }
 0x57b   :  { %v1467_v39 = vadd.f32 %v2471_v62, %v1466_v63  ;;  %v2304_v63 = vld [vmem:[#allocation13 + $0x24] sm:$0xf0] }
 0x57d   :  { %v3205_v15 = vadd.f32 %v2573_v41, %v1467_v39  ;;  %v2303_v39 = vld [vmem:[#allocation13 + $0x24] sm:$0xf] }
 0x57f   :  { %1482 = vadd.xlane.f32.xlu0 %v3205_v15 }
 0x582   :  { %v1468_v58 = vpop.f32.mrf.mxu0 }
 0x583   :  { %v1469_v28 = vadd.f32 %v2471_v62, %v1468_v58  ;;  %v2159_v58 = vld [vmem:[#allocation13 + $0x28] sm:$0xf0] }
 0x585   :  { %v3208_v42 = vadd.f32 %v2574_v52, %v1469_v28  ;;  %v2162_v28 = vor.u32 %v2303_v39, %v2159_v58  ;;  %v2149_v52 = vld [vmem:[#allocation13 + $0x10] sm:$0xf] }
 0x587   :  { %1484 = vadd.xlane.f32.xlu2 %v3208_v42  ;;  %1704 = vmatpush.bf16.msra.mxu2 %v2162_v28 }
 0x5cb   :  { %v1471_v61 = vpop.f32.mrf.mxu0 }
 0x5cc   :  { %v1472_v45 = vadd.f32 %v2471_v62, %v1471_v61  ;;  %v2302_v61 = vld [vmem:[#allocation13 + $0x14] sm:$0xf0] }
 0x5ce   :  { %v3211_v33 = vadd.f32 %v2575_v44, %v1472_v45  ;;  %v2301_v45 = vld [vmem:[#allocation13 + $0x14] sm:$0xf]  ;;  %v2150_v44 = vor.u32 %v2302_v61, %v2149_v52 }
 0x5d0   :  { %1486 = vadd.xlane.f32.xlu1 %v3211_v33 }
 0x5d3   :  { %v1473_v48 = vpop.f32.mrf.mxu0 }
 0x5d4   :  { %v1474_v38 = vadd.f32 %v2471_v62, %v1473_v48  ;;  %v2157_v62 = vld [vmem:[#allocation13 + $0x20] sm:$0xf]  ;;  %v2151_v48 = vld [vmem:[#allocation13 + $0x18] sm:$0xf0] }
 0x5d5   :  { %v2158_v41 = vor.u32 %v2304_v63, %v2157_v62 }
 0x5d6   :  { %v3214_v47 = vadd.f32 %v2576_v46, %v1474_v38  ;;  %v2141_v38 = vld [vmem:[#allocation13] sm:$0xf]  ;;  %v2300_v46 = vld [vmem:[#allocation13 + $0x4] sm:$0xf0] }
 0x5d7   :  { %1685 = vmatpush.bf16.msrb.mxu1 %v2158_v41 }
 0x5d8   :  { %1488 = vadd.xlane.f32.xlu0 %v3214_v47 }
 0x5db   :  { %1686 = vmatpush.bf16.msrb.mxu1 %v2150_v44 }
 0x5f2   :  { %v1483_v49 = vpop.xlane.xlu0 %1482 }
 0x5f3   :  { %v1490_v50 = vmul.f32 %v1483_v49, %v2927_v10 }
 0x5f5   :  { %v3219_v54 = vsub.f32 %v3205_v15, %v1490_v50  ;;  %v2154_v50 = vor.u32 %v2301_v45, %v2151_v48 }
 0x5f7   :  { %v1498_v55 = vmul.f32 %v3219_v54, %v3219_v54  ;;  %1705 = vmatpush.bf16.msra.mxu2 %v2154_v50 }
 0x5f9   :  { %1502 = vadd.xlane.f32.xlu2 %v1498_v55  ;;  %v2299_v55 = vld [vmem:[#allocation13 + $0x4] sm:$0xf] }
 0x5fa   :  { %v1485_v53 = vpop.xlane.xlu2 %1484 }
 0x5fb   :  { %v1491_v43 = vmul.f32 %v1485_v53, %v2927_v10  ;;  %v2143_v53 = vld [vmem:[#allocation13 + $0x8] sm:$0xf0] }
 0x5fd   :  { %v3225_v3 = vsub.f32 %v3208_v42, %v1491_v43 }
 0x5ff   :  { %v1499_v56 = vmul.f32 %v3225_v3, %v3225_v3 }
 0x601   :  { %1504 = vadd.xlane.f32.xlu1 %v1499_v56  ;;  %v2142_v56 = vor.u32 %v2300_v46, %v2141_v38 }
 0x603   :  { %1687 = vmatpush.bf16.msrb.mxu1 %v2142_v56  ;;  %v2330_v56 = vld [vmem:[#allocation14 + $0x78] sm:$0xff] }
 0x604   :  { %1945 = vmatpush.bf16.msra.mxu0 %v2330_v56 }
 0x643   :  { %v1487_v7 = vpop.xlane.xlu1 %1486 }
 0x644   :  { %v1492_v59 = vmul.f32 %v1487_v7, %v2927_v10  ;;  %v2146_v7 = vor.u32 %v2299_v55, %v2143_v53  ;;  %v2322_v53 = vld [vmem:[#allocation14 + $0x38] sm:$0xff] }
 0x645   :  { %1926 = vmatpush.bf16.msrb.mxu3 %v2322_v53 }
 0x646   :  { %v3231_v60 = vsub.f32 %v3211_v33, %v1492_v59  ;;  %1706 = vmatpush.bf16.msra.mxu2 %v2146_v7  ;;  %v2329_v7 = vld [vmem:[#allocation14 + $0x70] sm:$0xff] }
 0x647   :  { %1946 = vmatpush.bf16.msra.mxu0 %v2329_v7 }
 0x648   :  { %v1500_v0 = vmul.f32 %v3231_v60, %v3231_v60 }
 0x64a   :  { %1506 = vadd.xlane.f32.xlu0 %v1500_v0 }
 0x64b   :  { %v1489_v1 = vpop.xlane.xlu0 %1488 }
 0x64c   :  { %v1493_v2 = vmul.f32 %v1489_v1, %v2927_v10 }
 0x64e   :  { %v3237_v4 = vsub.f32 %v3214_v47, %v1493_v2 }
 0x650   :  { %v1501_v5 = vmul.f32 %v3237_v4, %v3237_v4 }
 0x652   :  { %1508 = vadd.xlane.f32.xlu2 %v1501_v5 }
 0x66c   :  { %v1503_v49 = vpop.xlane.xlu2 %1502 }
 0x66d   :  { %v1510_v43 = vmul.f32 %v1503_v49, %v2927_v10 }
 0x66f   :  { %v1514_v59 = vadd.f32 1e-06, %v1510_v43  ;;  %v2321_v43 = vld [vmem:[#allocation14 + $0x30] sm:$0xff] }
 0x670   :  { %1927 = vmatpush.bf16.msrb.mxu3 %v2321_v43 }
 0x671   :  { %2549 = vrsqrt.f32 %v1514_v59  ;;  %vm1524_vm2 = vweird.f32 %v1514_v59 }
 0x674   :  { %v1505_v0 = vpop.xlane.xlu1 %1504 }
 0x675   :  { %v1511_v1 = vmul.f32 %v1505_v0, %v2927_v10  ;;  %v2318_v0 = vld [vmem:[#allocation14 + $0x18] sm:$0xff] }
 0x677   :  { %v2550_v2 = vpop.eup %2549  ;;  %v1515_v5 = vadd.f32 1e-06, %v1511_v1  ;;  %v2327_v1 = vld [vmem:[#allocation14 + $0x60] sm:$0xff] }
 0x678   :  { %v1519_v6 = vmul.f32 %v2550_v2, %v1514_v59  ;;  %vm1525_vm1 = vweird.f32 %v2550_v2  ;;  %v2319_v59 = vld [vmem:[#allocation14 + $0x20] sm:$0xff] }
 0x679   :  { %2551 = vrsqrt.f32 %v1515_v5  ;;  %vm1526_vm3 = vmor %vm1524_vm2, %vm1525_vm1  ;;  %vm1534_vm5 = vweird.f32 %v1515_v5 }
 0x67a   :  { %v1520_v26 = vmul.f32 %v2550_v2, %v1519_v6  ;;  %v2316_v6 = vld [vmem:[#allocation14 + $0x8] sm:$0xff] }
 0x67c   :  { %v1521_v51 = vmul.f32 0.5, %v1520_v26  ;;  %v1594_v26 = vld [vmem:[%s3293_s10] sm:$0x3] }
 0x67e   :  { %v1522_v8 = vsub.f32 1.5, %v1521_v51  ;;  %v2325_v51 = vld [vmem:[#allocation14 + $0x50] sm:$0xff] }
 0x67f   :  { %v2552_v13 = vpop.eup %2551 }
 0x680   :  { %v1523_v9 = vmul.f32 %v2550_v2, %v1522_v8  ;;  %v1529_v29 = vmul.f32 %v2552_v13, %v1515_v5  ;;  %vm1535_vm4 = vweird.f32 %v2552_v13  ;;  %v2326_v5 = vld [vmem:[#allocation14 + $0x58] sm:$0xff]  ;;  %v2315_v8 = vld [vmem:[#allocation14] sm:$0xff] }
 0x681   :  { %vm1536_vm6 = vmor %vm1534_vm5, %vm1535_vm4 }
 0x682   :  { %v1530_v11 = vmul.f32 %v2552_v13, %v1529_v29  ;;  %v1527_v14 = vsel %vm1526_vm3, %v2550_v2, %v1523_v9  ;;  %v2317_v2 = vld [vmem:[#allocation14 + $0x10] sm:$0xff]  ;;  %v2324_v9 = vld [vmem:[#allocation14 + $0x48] sm:$0xff] }
 0x683   :  { %v1558_v18 = vmul.f32 %v1527_v14, %v3219_v54  ;;  %v2323_v14 = vld [vmem:[#allocation14 + $0x40] sm:$0xff] }
 0x684   :  { %v1531_v12 = vmul.f32 0.5, %v1530_v11 }
 0x685   :  { %v1565_v21 = vmul.f32 %v2472_v19, %v1558_v18 }
 0x686   :  { %v1532_v17 = vsub.f32 1.5, %v1531_v12 }
 0x687   :  { %v1572_v22 = vadd.f32 %v2473_v16, %v1565_v21 }
 0x688   :  { %v1533_v23 = vmul.f32 %v2552_v13, %v1532_v17  ;;  %v3261_v17 = vperm.slane %v1594_v26, 1 }
 0x68a   :  { %v1537_v20 = vsel %vm1536_vm6, %v2552_v13, %v1533_v23  ;;  %v3258_v13 = vperm.slane %v1594_v26, 0 }
 0x68b   :  { %v1559_v35 = vmul.f32 %v1537_v20, %v3225_v3 }
 0x68d   :  { %v1566_v27 = vmul.f32 %v2472_v19, %v1559_v35 }
 0x68f   :  { %v1573_v25 = vadd.f32 %v2473_v16, %v1566_v27 }
 0x691   :  { %v1576_v24 = vpack.c.bf16 %v1573_v25, %v1572_v22 }
 0x693   :  { %1688 = vmatmul.bf16.vlgmr.msrb.gmra.mxu1 %v1576_v24  ;;  %1707 = vmatmul.bf16.vlgmr.msra.gmra.mxu2 %v1576_v24 }
 0x6bd   :  { %v1507_v54 = vpop.xlane.xlu0 %1506 }
 0x6be   :  { %v1512_v40 = vmul.f32 %v1507_v54, %v2927_v10 }
 0x6c0   :  { %v1516_v30 = vadd.f32 1e-06, %v1512_v40 }
 0x6c2   :  { %2553 = vrsqrt.f32 %v1516_v30  ;;  %vm1544_vm8 = vweird.f32 %v1516_v30 }
 0x6c5   :  { %v1509_v31 = vpop.xlane.xlu2 %1508 }
 0x6c6   :  { %v1513_v57 = vmul.f32 %v1509_v31, %v2927_v10 }
 0x6c8   :  { %v2554_v3 = vpop.eup %2553  ;;  %v1517_v32 = vadd.f32 1e-06, %v1513_v57 }
 0x6c9   :  { %v1539_v34 = vmul.f32 %v2554_v3, %v1516_v30  ;;  %vm1545_vm7 = vweird.f32 %v2554_v3 }
 0x6ca   :  { %2555 = vrsqrt.f32 %v1517_v32  ;;  %vm1546_vm9 = vmor %vm1544_vm8, %vm1545_vm7  ;;  %vm1554_vm11 = vweird.f32 %v1517_v32 }
 0x6cb   :  { %v1540_v36 = vmul.f32 %v2554_v3, %v1539_v34 }
 0x6cd   :  { %v1541_v37 = vmul.f32 0.5, %v1540_v36 }
 0x6cf   :  { %v1542_v62 = vsub.f32 1.5, %v1541_v37 }
 0x6d0   :  { %v2556_v63 = vpop.eup %2555 }
 0x6d1   :  { %v1543_v39 = vmul.f32 %v2554_v3, %v1542_v62  ;;  %v1549_v41 = vmul.f32 %v2556_v63, %v1517_v32  ;;  %vm1555_vm10 = vweird.f32 %v2556_v63 }
 0x6d2   :  { %vm1556_vm12 = vmor %vm1554_vm11, %vm1555_vm10 }
 0x6d3   :  { %v1550_v58 = vmul.f32 %v2556_v63, %v1549_v41  ;;  %v1547_v52 = vsel %vm1546_vm9, %v2554_v3, %v1543_v39 }
 0x6d4   :  { %v1560_v10 = vmul.f32 %v1547_v52, %v3231_v60  ;;  %v2320_v60 = vld [vmem:[#allocation14 + $0x28] sm:$0xff] }
 0x6d5   :  { %v1551_v28 = vmul.f32 0.5, %v1550_v58  ;;  %1928 = vmatpush.bf16.msrb.mxu3 %v2320_v60 }
 0x6d6   :  { %v1567_v38 = vmul.f32 %v2472_v19, %v1560_v10 }
 0x6d7   :  { %v1552_v61 = vsub.f32 1.5, %v1551_v28 }
 0x6d8   :  { %v1574_v49 = vadd.f32 %v2473_v16, %v1567_v38 }
 0x6d9   :  { %v1553_v45 = vmul.f32 %v2556_v63, %v1552_v61  ;;  %1929 = vmatpush.bf16.msrb.mxu3 %v2319_v59 }
 0x6db   :  { %v1557_v44 = vsel %vm1556_vm12, %v2556_v63, %v1553_v45 }
 0x6dc   :  { %v1561_v48 = vmul.f32 %v1557_v44, %v3237_v4  ;;  %v2328_v4 = vld [vmem:[#allocation14 + $0x68] sm:$0xff] }
 0x6dd   :  { %1947 = vmatpush.bf16.msra.mxu0 %v2328_v4  ;;  %1930 = vmatpush.bf16.msrb.mxu3 %v2318_v0 }
 0x6de   :  { %v1568_v46 = vmul.f32 %v2472_v19, %v1561_v48 }
 0x6e0   :  { %v1575_v50 = vadd.f32 %v2473_v16, %v1568_v46 }
 0x6e1   :  { %1948 = vmatpush.bf16.msra.mxu0 %v2327_v1  ;;  %1931 = vmatpush.bf16.msrb.mxu3 %v2317_v2 }
 0x6e2   :  { %v1577_v55 = vpack.c.bf16 %v1575_v50, %v1574_v49 }
 0x6e4   :  { %1693 = vmatmul.bf16.gmra.mxu1 %v1577_v55  ;;  %1712 = vmatmul.bf16.gmra.mxu2 %v1577_v55 }
 0x6e5   :  { %1949 = vmatpush.bf16.msra.mxu0 %v2326_v5  ;;  %1932 = vmatpush.bf16.msrb.mxu3 %v2316_v6 }
 0x6e9   :  { %1950 = vmatpush.bf16.msra.mxu0 %v2325_v51  ;;  %1933 = vmatpush.bf16.msrb.mxu3 %v2315_v8 }
 0x6ed   :  { %1951 = vmatpush.bf16.msra.mxu0 %v2324_v9 }
 0x6f1   :  { %1952 = vmatpush.bf16.msra.mxu0 %v2323_v14 }
 0x710   :  { %v1689_v29 = vpop.f32.mrf.mxu1 }
 0x711   :  { %v1690_v11 = vadd.f32 %v1689_v29, %v3258_v13 }
 0x713   :  { %v1718_v12 = vmul.f32 0.044715, %v1690_v11  ;;  %v1758_v61 = vmul.f32 0.5, %v1690_v11 }
 0x715   :  { %v1726_v18 = vmul.f32 %v1718_v12, %v1690_v11 }
 0x716   :  { %v1708_v19 = vpop.f32.mrf.mxu2 }
 0x717   :  { %v1734_v23 = vmul.f32 %v1726_v18, %v1690_v11  ;;  %v1709_v20 = vadd.f32 %v1708_v19, %v3261_v17 }
 0x718   :  { %v1691_v35 = vpop.f32.mrf.mxu1 }
 0x719   :  { %v1742_v21 = vadd.f32 %v1734_v23, %v1690_v11  ;;  %v1719_v16 = vmul.f32 0.044715, %v1709_v20  ;;  %v1692_v27 = vadd.f32 %v1691_v35, %v3258_v13  ;;  %v1759_v55 = vmul.f32 0.5, %v1709_v20 }
 0x71b   :  { %v1727_v22 = vmul.f32 %v1719_v16, %v1709_v20  ;;  %v1720_v25 = vmul.f32 0.044715, %v1692_v27  ;;  %v1750_v24 = vmul.f32 0.7978846, %v1742_v21  ;;  %v1760_v10 = vmul.f32 0.5, %v1692_v27 }
 0x71d   :  { %v1735_v54 = vmul.f32 %v1727_v22, %v1709_v20  ;;  %v1728_v40 = vmul.f32 %v1720_v25, %v1692_v27  ;;  %2557 = vtanh.f32 %v1750_v24 }
 0x71e   :  { %v1710_v30 = vpop.f32.mrf.mxu2 }
 0x71f   :  { %v1743_v31 = vadd.f32 %v1735_v54, %v1709_v20  ;;  %v1736_v57 = vmul.f32 %v1728_v40, %v1692_v27  ;;  %v1711_v3 = vadd.f32 %v1710_v30, %v3261_v17 }
 0x721   :  { %v1744_v32 = vadd.f32 %v1736_v57, %v1692_v27  ;;  %v1721_v34 = vmul.f32 0.044715, %v1711_v3  ;;  %v1751_v36 = vmul.f32 0.7978846, %v1743_v31  ;;  %v1761_v53 = vmul.f32 0.5, %v1711_v3 }
 0x723   :  { %v1752_v37 = vmul.f32 0.7978846, %v1744_v32  ;;  %v1729_v62 = vmul.f32 %v1721_v34, %v1711_v3  ;;  %v2558_v39 = vpop.eup %2557 }
 0x724   :  { %v1774_v28 = vadd.f32 1.0, %v2558_v39 }
 0x725   :  { %v1737_v63 = vmul.f32 %v1729_v62, %v1711_v3  ;;  %2559 = vtanh.f32 %v1752_v37 }
 0x726   :  { %2561 = vtanh.f32 %v1751_v36  ;;  %v1782_v48 = vmul.f32 %v1774_v28, %v1758_v61 }
 0x727   :  { %v1745_v41 = vadd.f32 %v1737_v63, %v1711_v3 }
 0x729   :  { %v1753_v58 = vmul.f32 0.7978846, %v1745_v41 }
 0x72b   :  { %v2560_v52 = vpop.eup %2559  ;;  %2563 = vtanh.f32 %v1753_v58 }
 0x72c   :  { %v1776_v45 = vadd.f32 1.0, %v2560_v52  ;;  %v2562_v44 = vpop.eup %2561 }
 0x72d   :  { %v1775_v49 = vadd.f32 1.0, %v2562_v44 }
 0x72e   :  { %v1784_v38 = vmul.f32 %v1776_v45, %v1760_v10  ;;  %v2474_v10 = vld [vmem:[%s3295_s12] ss:$0 sm:$0xff]  ;;  %s2822_s12 = smov [#allocation16]  }
 0x72f   :  { %v1783_v56 = vmul.f32 %v1775_v49, %v1759_v55  ;;  %s1976_s18 = sshll.u32 %s2822_s12, 4  ;;  %s1977_s18 = int_to_ptr.vmem [resolvable:$true] %s1976_s18 }
 0x730   :  { %v1790_v46 = vpack.c.bf16 %v1784_v38, %v1782_v48 }
 0x731   :  { %v2564_v50 = vpop.eup %2563 }
 0x732   :  { %1934 = vmatmul.bf16.vlgmr.msrb.gmra.mxu3 %v1790_v46  ;;  %v1777_v43 = vadd.f32 1.0, %v2564_v50 }
 0x734   :  { %v1785_v60 = vmul.f32 %v1777_v43, %v1761_v53 }
 0x736   :  { %v1791_v7 = vpack.c.bf16 %v1785_v60, %v1783_v56 }
 0x738   :  { %1953 = vmatmul.bf16.vlgmr.msra.gmra.mxu0 %v1791_v7 }
 0x761   :  { %v1694_v59 = vpop.f32.mrf.mxu1 }
 0x762   :  { %v1695_v4 = vadd.f32 %v1694_v59, %v3258_v13 }
 0x764   :  { %v1722_v0 = vmul.f32 0.044715, %v1695_v4  ;;  %v1762_v57 = vmul.f32 0.5, %v1695_v4 }
 0x766   :  { %v1730_v1 = vmul.f32 %v1722_v0, %v1695_v4 }
 0x767   :  { %v1713_v2 = vpop.f32.mrf.mxu2 }
 0x768   :  { %v1714_v5 = vadd.f32 %v1713_v2, %v3261_v17  ;;  %v1738_v6 = vmul.f32 %v1730_v1, %v1695_v4 }
 0x769   :  { %v1696_v26 = vpop.f32.mrf.mxu1 }
 0x76a   :  { %v1723_v51 = vmul.f32 0.044715, %v1714_v5  ;;  %v1697_v8 = vadd.f32 %v1696_v26, %v3258_v13  ;;  %v1746_v9 = vadd.f32 %v1738_v6, %v1695_v4  ;;  %v1763_v39 = vmul.f32 0.5, %v1714_v5 }
 0x76c   :  { %v1724_v29 = vmul.f32 0.044715, %v1697_v8  ;;  %v1731_v11 = vmul.f32 %v1723_v51, %v1714_v5  ;;  %v1754_v12 = vmul.f32 0.7978846, %v1746_v9  ;;  %v1764_v3 = vmul.f32 0.5, %v1697_v8 }
 0x76e   :  { %v1732_v14 = vmul.f32 %v1724_v29, %v1697_v8  ;;  %v1739_v18 = vmul.f32 %v1731_v11, %v1714_v5  ;;  %2565 = vtanh.f32 %v1754_v12 }
 0x76f   :  { %v1715_v19 = vpop.f32.mrf.mxu2 }
 0x770   :  { %v1716_v23 = vadd.f32 %v1715_v19, %v3261_v17  ;;  %v1740_v20 = vmul.f32 %v1732_v14, %v1697_v8  ;;  %v1747_v35 = vadd.f32 %v1739_v18, %v1714_v5 }
 0x772   :  { %v1725_v21 = vmul.f32 0.044715, %v1716_v23  ;;  %v1748_v16 = vadd.f32 %v1740_v20, %v1697_v8  ;;  %v1755_v25 = vmul.f32 0.7978846, %v1747_v35  ;;  %v1765_v41 = vmul.f32 0.5, %v1716_v23 }
 0x774   :  { %v1756_v27 = vmul.f32 0.7978846, %v1748_v16  ;;  %v1733_v22 = vmul.f32 %v1725_v21, %v1716_v23  ;;  %v2566_v13 = vpop.eup %2565 }
 0x775   :  { %v1778_v30 = vadd.f32 1.0, %v2566_v13 }
 0x776   :  { %2567 = vtanh.f32 %v1756_v27  ;;  %v1741_v24 = vmul.f32 %v1733_v22, %v1716_v23 }
 0x777   :  { %2569 = vtanh.f32 %v1755_v25  ;;  %v1786_v34 = vmul.f32 %v1778_v30, %v1762_v57 }
 0x778   :  { %v1749_v54 = vadd.f32 %v1741_v24, %v1716_v23 }
 0x77a   :  { %v1757_v40 = vmul.f32 0.7978846, %v1749_v54 }
 0x77c   :  { %v2568_v31 = vpop.eup %2567  ;;  %2571 = vtanh.f32 %v1757_v40 }
 0x77d   :  { %v1780_v17 = vadd.f32 1.0, %v2568_v31  ;;  %v2570_v32 = vpop.eup %2569 }
 0x77e   :  { %v1779_v62 = vadd.f32 1.0, %v2570_v32 }
 0x77f   :  { %v1788_v36 = vmul.f32 %v1780_v17, %v1764_v3 }
 0x780   :  { %v1787_v28 = vmul.f32 %v1779_v62, %v1763_v39 }
 0x781   :  { %v1792_v37 = vpack.c.bf16 %v1788_v36, %v1786_v34 }
 0x782   :  { %v2572_v63 = vpop.eup %2571 }
 0x783   :  { %1939 = vmatmul.bf16.gmra.mxu3 %v1792_v37  ;;  %v1781_v58 = vadd.f32 1.0, %v2572_v63 }
 0x785   :  { %v1789_v52 = vmul.f32 %v1781_v58, %v1765_v41 }
 0x787   :  { %v1793_v61 = vpack.c.bf16 %v1789_v52, %v1787_v28 }
 0x789   :  { %1958 = vmatmul.bf16.gmra.mxu0 %v1793_v61 }
 0x7b5   :  { %v1935_v45 = vpop.f32.mrf.mxu3  ;;  %v1954_v44 = vpop.f32.mrf.mxu0 }
 0x7b6   :  { %v1936_v48 = vadd.f32 %v2474_v10, %v1935_v45 }
 0x7b8   :  { %v1955_v38 = vadd.f32 %v1954_v44, %v1936_v48 }
 0x7ba   :  { %v1964_v46 = vadd.f32 %v1955_v38, %v3205_v15 }
 0x7bc   :  { %1968 = vst [vmem:[#allocation16] sm:$0xff] %v1964_v46 }
 0x7bd   :  { %v1937_v49 = vpop.f32.mrf.mxu3  ;;  %v1956_v55 = vpop.f32.mrf.mxu0 }
 0x7be   :  { %v1938_v50 = vadd.f32 %v2474_v10, %v1937_v49 }
 0x7c0   :  { %v1957_v53 = vadd.f32 %v1956_v55, %v1938_v50 }
 0x7c2   :  { %v1965_v43 = vadd.f32 %v1957_v53, %v3208_v42 }
 0x7c4   :  { %1969 = vst [vmem:[#allocation16 + $0x8] sm:$0xff] %v1965_v43 }
 0x806   :  { %v1940_v56 = vpop.f32.mrf.mxu3  ;;  %v1959_v60 = vpop.f32.mrf.mxu0 }
 0x807   :  { %v1941_v7 = vadd.f32 %v2474_v10, %v1940_v56 }
 0x809   :  { %v1960_v59 = vadd.f32 %v1959_v60, %v1941_v7 }
 0x80b   :  { %v1966_v4 = vadd.f32 %v1960_v59, %v3211_v33 }
 0x80d   :  { %1970 = vst [vmem:[#allocation16 + $0x10] sm:$0xff] %v1966_v4 }
 0x80e   :  { %v1942_v0 = vpop.f32.mrf.mxu3  ;;  %v1961_v2 = vpop.f32.mrf.mxu0 }
 0x80f   :  { %v1943_v1 = vadd.f32 %v2474_v10, %v1942_v0 }
 0x811   :  { %v1962_v15 = vadd.f32 %v1961_v2, %v1943_v1 }
 0x813   :  { %v1967_v42 = vadd.f32 %v1962_v15, %v3214_v47 }
 0x815   :  { %1971 = vst [vmem:[#allocation16 + $0x18] sm:$0xff] %v1967_v42 }
 0x816   :  { %1984 = dma.vmem_to_hbm [thread:$0]  %s1977_s18, 512, %s1979_s21, [#allocation4], %s2811_s28, %s2811_s28, %s2812_s29  }
 0x817   :  { %2803 = dma.done.wait [#allocation4], 512  }
 0x818   :  { %2804 = vsyncadd [#allocation4], 4294966784 }
 0x819   :  { %1989 = vsyncpa [#allocation3], 1 }
 0x81a   :  { %1990 = vsyncpa [#allocation6], 1 }
 0x81b   :  { %1991 = vsyncpa [#allocation9], 1 }
 0x81c   :  { %1992 = vsyncpa [#allocation12], 1 }
 0x81d   :  { %1993 = vsyncpa [#allocation15], 1 }
 0x81e   :  { %1994 = vsyncpa [#allocation4], 1 }

</bundles_post_ra>
